<compile_context>
chip_gen: v7x
topology: tpu7x:2x2x1
jax: 0.10.0
libtpu: 0.0.40
codegen_flags: <defaults>
</compile_context>

<pallas_src>
import functools

import numpy as np
import jax
import jax.numpy as jnp
from jax.experimental import pallas as pl
from jax.experimental.pallas import tpu as pltpu

GROUPS = 32
BASE_WIDTH = 8
EXPANSION = 4
SG_CH = 256                      # lanes per super-group (dense output slab)
STEM_CIN_PAD = 8                 # 3 -> 8 so stem im2col K = 7*7*8 = 392
STEM_COUT_PAD = 128              # 64 -> 128 lane-dense stem/maxpool
LAYER_CFG = ((64, 3, 1), (128, 4, 2), (256, 23, 2), (512, 3, 2))  # resnext101_32x8d

# Multiple-of-8 M-tile candidates, including divisors of 2^k * 7^2 shapes
# (224x224 gives M = 25088 / 6272 / 1568 / 392 / 98 at batch 2).
_M_TILE_CANDS = (512, 448, 392, 256, 128, 112, 64, 56, 32, 16, 8)


def _pick(dim, cands):
    for c in cands:
        if dim % c == 0:
            return c
    return dim


def _tile_m(M):
    """Pick an 8-aligned M tile; if no exact divisor exists, pad M up."""
    for c in _M_TILE_CANDS:
        if M % c == 0:
            return c, M
    tm = 256 if M >= 256 else ((M + 7) // 8) * 8
    return tm, ((M + tm - 1) // tm) * tm


# ----------------------------------------------------------------------------
# Pallas kernels
# ----------------------------------------------------------------------------
def _dense_mm_kernel(*refs, act, nk, has_res):
    """Tiled matmul with fused scale/shift (+residual) (+relu|sigmoid) epilogue."""
    if has_res:
        a_ref, b_ref, s_ref, t_ref, r_ref, o_ref, acc_ref = refs
    else:
        a_ref, b_ref, s_ref, t_ref, o_ref, acc_ref = refs
        r_ref = None
    k = pl.program_id(2)

    @pl.when(k == 0)
    def _():
        acc_ref[...] = jnp.zeros_like(acc_ref)

    acc_ref[...] += jnp.dot(a_ref[...], b_ref[...],
                            preferred_element_type=jnp.float32)

    @pl.when(k == nk - 1)
    def _():
        y = acc_ref[...] * s_ref[...] + t_ref[...]          # f32 epilogue math
        if has_res:
            y = y + r_ref[...].astype(jnp.float32)
        if act == "relu":
            y = jnp.maximum(y, 0.0)
        elif act == "sigmoid":
            y = 1.0 / (1.0 + jnp.exp(-y))
        o_ref[...] = y.astype(o_ref.dtype)


def _grouped_mm_kernel(a_ref, b_ref, s_ref, t_ref, o_ref):
    """Super-group block-diagonal grouped conv.

    The 9-tap (3x3) reduction is unrolled in-kernel; the (9,256,256) weight
    block is resident in VMEM across the inner m grid axis (index_map constant
    in m), so it is DMA'd once per super-group.
    """
    acc = jnp.dot(a_ref[0], b_ref[0, 0], preferred_element_type=jnp.float32)
    for kk in range(1, 9):
        acc = acc + jnp.dot(a_ref[kk], b_ref[0, kk],
                            preferred_element_type=jnp.float32)
    y = jnp.maximum(acc * s_ref[...] + t_ref[...], 0.0)
    o_ref[...] = y.astype(o_ref.dtype)


def _maxpool_kernel(p_ref, o_ref):
    acc = p_ref[0]
    for i in range(1, p_ref.shape[0]):
        acc = jnp.maximum(acc, p_ref[i])
    o_ref[...] = acc


def _mean_kernel(x_ref, o_ref):
    hw = x_ref.shape[1]
    o_ref[...] = (jnp.sum(x_ref[...].astype(jnp.float32), axis=1)
                  * (1.0 / hw)).astype(o_ref.dtype)


# ----------------------------------------------------------------------------
# Pallas wrappers
# ----------------------------------------------------------------------------
@functools.partial(jax.jit, static_argnames=("act", "out_dtype"))
def dense_matmul_fused(a, b, scale, shift, residual=None, *,
                       act="none", out_dtype=jnp.bfloat16):
    """a:(M,K) bf16, b:(K,N) bf16 -> (M,N) with fused BN/act/residual epilogue.

    M is padded up to a tile multiple when it has no 8-aligned divisor; rows
    are independent so the pad rows are sliced off afterwards.
    """
    M, K = a.shape
    N = b.shape[1]
    tm, Mp = _tile_m(M)
    if Mp != M:
        a = jnp.pad(a, ((0, Mp - M), (0, 0)))
        if residual is not None:
            residual = jnp.pad(residual, ((0, Mp - M), (0, 0)))
    tn = _pick(N, (512, 256, 128))
    tk = _pick(K, (1024, 512, 448, 392, 256, 128))
    nm, nn, nk = Mp // tm, N // tn, K // tk

    in_specs = [
        pl.BlockSpec((tm, tk), lambda m, n, k: (m, k)),
        pl.BlockSpec((tk, tn), lambda m, n, k: (k, n)),
        pl.BlockSpec((1, tn), lambda m, n, k: (0, n)),
        pl.BlockSpec((1, tn), lambda m, n, k: (0, n)),
    ]
    args = [a, b, scale.reshape(1, N), shift.reshape(1, N)]
    has_res = residual is not None
    if has_res:
        in_specs.append(pl.BlockSpec((tm, tn), lambda m, n, k: (m, n)))
        args.append(residual)

    out = pl.pallas_call(
        functools.partial(_dense_mm_kernel, act=act, nk=nk, has_res=has_res),
        out_shape=jax.ShapeDtypeStruct((Mp, N), out_dtype),
        grid=(nm, nn, nk),
        in_specs=in_specs,
        out_specs=pl.BlockSpec((tm, tn), lambda m, n, k: (m, n)),
        scratch_shapes=[pltpu.VMEM((tm, tn), jnp.float32)],
        compiler_params=pltpu.CompilerParams(
            dimension_semantics=("parallel", "parallel", "arbitrary")),
    )(*args)
    return out[:M] if Mp != M else out


@functools.partial(jax.jit, static_argnames=("stride", "act"))
def conv1x1_fused(x, w, scale, shift, residual=None, *, stride, act):
    """1x1 conv (no im2col) + folded BN (+residual)(+relu). x NHWC bf16."""
    n, _, _, cin = x.shape
    cout = w.shape[1]
    # TODO(synk): fold the stride-2 subsample into the matmul BlockSpec instead
    # of this strided-gather pass (small HBM saving).
    xs = x if stride == 1 else x[:, ::stride, ::stride, :]
    _, oh, ow, _ = xs.shape
    a = xs.reshape(n * oh * ow, cin)
    res = None if residual is None else residual.reshape(n * oh * ow, cout)
    out = dense_matmul_fused(a, w, scale, shift, res, act=act)
    return out.reshape(n, oh, ow, cout)


@jax.jit
def stem_conv_fused(x, w, scale, shift):
    """7x7 stride-2 pad-3 stem conv + BN + ReLU.

    Input channels are zero-padded 3->8 (K = 392, 8-aligned) and output
    channels 64->128 (lane-dense stores); the extra output channels are exact
    zeros and are absorbed by zero rows in layer1's first conv weights.
    """
    n, h, wd, cin = x.shape
    k, s, pad = 7, 2, 3
    cout = w.shape[1]                       # 128 (padded)
    oh = (h + 2 * pad - k) // s + 1
    ow = (wd + 2 * pad - k) // s + 1
    xp = jnp.pad(x, ((0, 0), (pad, pad), (pad, pad), (0, STEM_CIN_PAD - cin)))
    pats = [jax.lax.slice(xp, (0, i, j, 0),
                          (n, i + (oh - 1) * s + 1, j + (ow - 1) * s + 1,
                           STEM_CIN_PAD),
                          (1, s, s, 1))
            for i in range(k) for j in range(k)]
    a = jnp.stack(pats, axis=3).reshape(n * oh * ow, k * k * STEM_CIN_PAD)
    out = dense_matmul_fused(a, w, scale, shift, act="relu")
    return out.reshape(n, oh, ow, cout)


@functools.partial(jax.jit, static_argnames=("stride",))
def grouped_conv3x3_fused(x, w_bd, scale, shift, *, stride):
    """Grouped 3x3 conv (groups=32) as super-group block-diagonal matmul + BN + ReLU.

    x: (N,H,W,Cin) bf16; w_bd: (num_sg, 9, 256, 256) bf16 block-diagonal.
    Grid = (super_group, m_tile); the 9-tap reduction runs inside the kernel
    with the weight block resident in VMEM across all m tiles of a super-group.
    """
    n, h, wd, cin = x.shape
    num_sg = w_bd.shape[0]
    cout = num_sg * SG_CH
    pad = 1
    oh = (h + 2 * pad - 3) // stride + 1
    ow = (wd + 2 * pad - 3) // stride + 1
    xp = jnp.pad(x, ((0, 0), (pad, pad), (pad, pad), (0, 0)))
    # TODO(synk): im2col still materializes the 9x-expanded patch tensor in HBM;
    # a fused window-gather kernel (manual DMA of shifted row slabs) would
    # remove that input traffic.
    pats = [jax.lax.slice(xp, (0, i, j, 0),
                          (n, i + (oh - 1) * stride + 1,
                           j + (ow - 1) * stride + 1, cin),
                          (1, stride, stride, 1))
            for i in range(3) for j in range(3)]
    a = jnp.stack(pats, axis=0).reshape(9, n * oh * ow, cin)   # (kk, M, Cin)
    M = n * oh * ow
    tm, Mp = _tile_m(M)
    if Mp != M:
        a = jnp.pad(a, ((0, 0), (0, Mp - M), (0, 0)))

    out = pl.pallas_call(
        _grouped_mm_kernel,
        out_shape=jax.ShapeDtypeStruct((Mp, cout), jnp.bfloat16),
        grid=(num_sg, Mp // tm),
        in_specs=[
            pl.BlockSpec((9, tm, SG_CH), lambda sg, m: (0, m, sg)),
            # Weight index depends only on sg -> fetched once per super-group.
            pl.BlockSpec((1, 9, SG_CH, SG_CH), lambda sg, m: (sg, 0, 0, 0)),
            pl.BlockSpec((1, SG_CH), lambda sg, m: (0, sg)),
            pl.BlockSpec((1, SG_CH), lambda sg, m: (0, sg)),
        ],
        out_specs=pl.BlockSpec((tm, SG_CH), lambda sg, m: (m, sg)),
        compiler_params=pltpu.CompilerParams(
            dimension_semantics=("parallel", "parallel")),
    )(a, w_bd, scale.reshape(1, cout), shift.reshape(1, cout))
    if Mp != M:
        out = out[:M]
    return out.reshape(n, oh, ow, cout)


@jax.jit
def maxpool_3x3_s2(x):
    n, h, w, c = x.shape
    k, s, pad = 3, 2, 1
    oh = (h + 2 * pad - k) // s + 1
    ow = (w + 2 * pad - k) // s + 1
    xp = jnp.pad(x, ((0, 0), (pad, pad), (pad, pad), (0, 0)),
                 constant_values=-jnp.inf)
    pts = [jax.lax.slice(xp, (0, i, j, 0),
                         (n, i + (oh - 1) * s + 1, j + (ow - 1) * s + 1, c),
                         (1, s, s, 1))
           for i in range(k) for j in range(k)]
    p = jnp.stack(pts, axis=0).reshape(k * k, n * oh * ow, c)
    M = n * oh * ow
    tm, Mp = _tile_m(M)
    if Mp != M:
        p = jnp.pad(p, ((0, 0), (0, Mp - M), (0, 0)))
    out = pl.pallas_call(
        _maxpool_kernel,
        out_shape=jax.ShapeDtypeStruct((Mp, c), x.dtype),
        grid=(Mp // tm,),
        in_specs=[pl.BlockSpec((k * k, tm, c), lambda m: (0, m, 0))],
        out_specs=pl.BlockSpec((tm, c), lambda m: (m, 0)),
        compiler_params=pltpu.CompilerParams(dimension_semantics=("parallel",)),
    )(p)
    if Mp != M:
        out = out[:M]
    return out.reshape(n, oh, ow, c)


@jax.jit
def global_avgpool(x):
    n, h, w, c = x.shape
    tc = _pick(c, (512, 256, 128))
    x3 = x.reshape(n, h * w, c)
    return pl.pallas_call(
        _mean_kernel,
        out_shape=jax.ShapeDtypeStruct((n, c), jnp.bfloat16),
        grid=(c // tc,),
        in_specs=[pl.BlockSpec((n, h * w, tc), lambda j: (0, 0, j))],
        out_specs=pl.BlockSpec((n, tc), lambda j: (0, j)),
        compiler_params=pltpu.CompilerParams(dimension_semantics=("parallel",)),
    )(x3)


# ----------------------------------------------------------------------------
# Deterministic parameter construction (synthetic, no checkpoint), pre-packed
# into matmul-ready layouts (no per-forward weight transposes).
# ----------------------------------------------------------------------------
def _normal(key, shape, std):
    return jax.random.normal(key, shape, jnp.float32) * std


def make_bn(key, c):
    k1, k2 = jax.random.split(key)
    gamma = jax.random.uniform(k1, (c,), jnp.float32, 0.5, 1.0)
    beta = _normal(k2, (c,), 0.02)
    # eval-mode fold: running_mean=0, running_var=1, eps=1e-5
    scale = gamma / jnp.sqrt(1.0 + 1e-5)
    shift = beta
    return scale, shift


def make_conv1x1_mat(key, cin, cout, cin_pad=None):
    w = _normal(key, (cout, cin), 1.0 / np.sqrt(cin)).T          # (Cin, Cout)
    if cin_pad is not None and cin_pad > cin:
        w = jnp.pad(w, ((0, cin_pad - cin), (0, 0)))             # zero rows
    return w.astype(jnp.bfloat16)


def make_stem_mat(key, cin=3, cout=64, k=7):
    w = _normal(key, (cout, cin, k, k), 1.0 / np.sqrt(cin * k * k))
    # K-order (kh, kw, cin) to match im2col stacking order; zero-pad cin/cout.
    w = w.transpose(2, 3, 1, 0)                                  # (kh,kw,cin,cout)
    w = jnp.pad(w, ((0, 0), (0, 0),
                    (0, STEM_CIN_PAD - cin), (0, STEM_COUT_PAD - cout)))
    return w.reshape(k * k * STEM_CIN_PAD, STEM_COUT_PAD).astype(jnp.bfloat16)


def make_grouped_bd(key, width, groups=GROUPS, k=3, sg_ch=SG_CH):
    """Block-diagonal super-group weights: (num_sg, k*k, sg_ch, sg_ch)."""
    cg = width // groups                   # in-channels per group == out per group
    cout_g = cg
    S = sg_ch // cout_g                    # groups per super-group
    num_sg = groups // S
    w = _normal(key, (width, cg, k, k), 1.0 / np.sqrt(cg * k * k))
    wt = w.reshape(num_sg, S, cout_g, cg, k * k)      # (sg, ls, o, c, kk)
    wt = wt.transpose(0, 4, 1, 3, 2)                  # (sg, kk, ls, c, o)
    eye = jnp.eye(S, dtype=wt.dtype)
    bd = jnp.einsum("fklco,lm->fklcmo", wt, eye)      # (sg, kk, ls, c, ls2, o)
    bd = bd.reshape(num_sg, k * k, S * cg, S * cout_g)
    return bd.astype(jnp.bfloat16)


def make_bottleneck(key, inplanes, planes, downsample, cin_pad=None):
    width = int(planes * (BASE_WIDTH / 64.0)) * GROUPS
    outp = planes * EXPANSION
    ks = jax.random.split(key, 8)
    p = {
        "w1": make_conv1x1_mat(ks[0], inplanes, width, cin_pad=cin_pad),
        "w2": make_grouped_bd(ks[2], width),
        "w3": make_conv1x1_mat(ks[4], width, outp),
    }
    p["s1"], p["t1"] = make_bn(ks[1], width)
    p["s2"], p["t2"] = make_bn(ks[3], width)
    p["s3"], p["t3"] = make_bn(ks[5], outp)
    if downsample:
        p["wd"] = make_conv1x1_mat(ks[6], inplanes, outp, cin_pad=cin_pad)
        p["sd"], p["td"] = make_bn(ks[7], outp)
    return p


def make_resnext(key):
    keys = jax.random.split(key, 6)
    params = {"stem_w": make_stem_mat(keys[0])}
    s, t = make_bn(keys[1], 64)
    # padded stem output channels: scale=1, shift=0 -> exact zeros after ReLU
    params["stem_s"] = jnp.concatenate([s, jnp.ones((STEM_COUT_PAD - 64,),
                                                    jnp.float32)])
    params["stem_t"] = jnp.concatenate([t, jnp.zeros((STEM_COUT_PAD - 64,),
                                                     jnp.float32)])
    inplanes = 64
    layers = []
    lkeys = jax.random.split(keys[2], len(LAYER_CFG))
    for li, (planes, blocks, stride) in enumerate(LAYER_CFG):
        bkeys = jax.random.split(lkeys[li], blocks)
        blist = []
        for bi in range(blocks):
            s_ = stride if bi == 0 else 1
            ds = (bi == 0) and (s_ != 1 or inplanes != planes * EXPANSION)
            # The very first block consumes the 128-padded stem activations.
            cin_pad = STEM_COUT_PAD if (li == 0 and bi == 0) else None
            blist.append(make_bottleneck(bkeys[bi], inplanes, planes, ds,
                                         cin_pad=cin_pad))
            inplanes = planes * EXPANSION
        layers.append(blist)
    params["layers"] = layers
    # fc: 2048 -> 1000, lane-padded to 1024; padded columns are exact zeros so
    # they can feed the classifier without slicing.
    fc_w = _normal(keys[3], (2048, 1000), 1.0 / np.sqrt(2048))
    fc_b = _normal(keys[4], (1000,), 0.01)
    params["fc_w"] = jnp.pad(fc_w, ((0, 0), (0, 24))).astype(jnp.bfloat16)
    params["fc_s"] = jnp.ones((1024,), jnp.float32)
    params["fc_t"] = jnp.pad(fc_b, (0, 24))
    return params


def make_model(key, n_classes):
    k1, k2, k3, k4 = jax.random.split(key, 4)
    ncls_pad = ((n_classes + 127) // 128) * 128
    cls_w = _normal(k3, (2000, n_classes), 1.0 / np.sqrt(2000))
    cls_w = jnp.pad(cls_w, ((0, 0), (0, ncls_pad - n_classes)))
    cls_b = _normal(k4, (n_classes,), 0.01)
    # Classifier K padded 2000 -> 2048: rows laid out to match the two 1024-wide
    # fc feature blocks (pad rows multiply exact-zero feature columns).
    w_full = jnp.zeros((2048, ncls_pad), jnp.float32)
    w_full = w_full.at[0:1000].set(cls_w[0:1000])
    w_full = w_full.at[1024:2024].set(cls_w[1000:2000])
    return {
        "model1": make_resnext(k1),
        "model2": make_resnext(k2),
        "cls_w": w_full.astype(jnp.bfloat16),
        "cls_s": jnp.ones((ncls_pad,), jnp.float32),
        "cls_t": jnp.pad(cls_b, (0, ncls_pad - n_classes)),
    }


# ----------------------------------------------------------------------------
# Forward pass
# ----------------------------------------------------------------------------
def bottleneck_forward(p, x, stride):
    out = conv1x1_fused(x, p["w1"], p["s1"], p["t1"], stride=1, act="relu")
    out = grouped_conv3x3_fused(out, p["w2"], p["s2"], p["t2"], stride=stride)
    if "wd" in p:
        identity = conv1x1_fused(x, p["wd"], p["sd"], p["td"],
                                 stride=stride, act="none")
    else:
        identity = x
    # conv3 + bn3 + residual add + relu fused into one matmul epilogue
    return conv1x1_fused(out, p["w3"], p["s3"], p["t3"], identity,
                         stride=1, act="relu")


def resnext_forward(params, x_nchw):
    x = jnp.transpose(x_nchw, (0, 2, 3, 1)).astype(jnp.bfloat16)  # NCHW -> NHWC bf16
    x = stem_conv_fused(x, params["stem_w"], params["stem_s"], params["stem_t"])
    x = maxpool_3x3_s2(x)
    for li, (planes, blocks, stride) in enumerate(LAYER_CFG):
        for bi in range(blocks):
            s = stride if bi == 0 else 1
            x = bottleneck_forward(params["layers"][li][bi], x, s)
    pooled = global_avgpool(x)                                    # (N, 2048) bf16
    # (N, 1024) bf16; columns 1000..1023 are exact zeros.
    return dense_matmul_fused(pooled, params["fc_w"], params["fc_s"],
                              params["fc_t"], act="none",
                              out_dtype=jnp.bfloat16)


def model_forward(params, x1, x2, n_classes):
    f1 = resnext_forward(params["model1"], x1)                    # (N, 1024)
    f2 = resnext_forward(params["model2"], x2)                    # (N, 1024)
    feats = jnp.concatenate([f1, f2], axis=1)                     # (N, 2048) bf16
    probs = dense_matmul_fused(feats, params["cls_w"], params["cls_s"],
                               params["cls_t"], act="sigmoid",
                               out_dtype=jnp.float32)             # (N, ncls_pad)
    return probs[:, :n_classes]


# ----------------------------------------------------------------------------
if __name__ == "__main__":
    key = jax.random.PRNGKey(0)
    kp, kx1, kx2 = jax.random.split(key, 3)
    n_classes = 5

    params = make_model(kp, n_classes)

    # Small but architecture-valid input: 32x32 reaches 1x1 at the last stage.
    x1 = jax.random.normal(kx1, (2, 3, 32, 32), jnp.float32)
    x2 = jax.random.normal(kx2, (2, 3, 32, 32), jnp.float32)

    out = model_forward(params, x1, x2, n_classes)
    out = jax.block_until_ready(out)
    assert out.shape == (2, n_classes)
    assert bool(jnp.all((out >= 0.0) & (out <= 1.0)))
    print("KERNEL_OK")
</pallas_src>

<mosaic_0001>
module attributes {stable_mosaic.version = 11 : i64} {
  func.func @_dense_mm_kernel(%arg0: i32, %arg1: i32, %arg2: i32, %arg3: memref<512x392xbf16, #tpu.memory_space<vmem>>, %arg4: memref<392x128xbf16, #tpu.memory_space<vmem>>, %arg5: memref<1x128xf32, #tpu.memory_space<vmem>>, %arg6: memref<1x128xf32, #tpu.memory_space<vmem>>, %arg7: memref<512x128xbf16, #tpu.memory_space<vmem>>, %arg8: memref<512x128xf32, #tpu.memory_space<vmem>>) attributes {dimension_semantics = [#tpu.dimension_semantics<parallel>, #tpu.dimension_semantics<parallel>, #tpu.dimension_semantics<arbitrary>], iteration_bounds = array<i64: 1, 1, 1>, scalar_prefetch = 0 : i64, scratch_operands = 1 : i64, tpu.core_type = #tpu.core_type<tc>, window_params = [{transform_indices = @transform_0, window_bounds = array<i64: 512, 392>}, {transform_indices = @transform_1, window_bounds = array<i64: 392, 128>}, {transform_indices = @transform_2, window_bounds = array<i64: 1, 128>}, {transform_indices = @transform_3, window_bounds = array<i64: 1, 128>}, {transform_indices = @transform_4, window_bounds = array<i64: 512, 128>}]} {
    %c0_i32 = arith.constant 0 : i32
    %0 = arith.cmpi eq, %arg2, %c0_i32 : i32
    %1 = arith.extui %0 : i1 to i32
    %c0_i32_0 = arith.constant 0 : i32
    %2 = arith.cmpi ne, %1, %c0_i32_0 : i32
    scf.if %2 {
      %cst_10 = arith.constant 0.000000e+00 : f32
      %12 = vector.broadcast %cst_10 : f32 to vector<512x128xf32>
      %c0_11 = arith.constant 0 : index
      %c0_12 = arith.constant 0 : index
      %13 = vector.load %arg8[%c0_11, %c0_12] : memref<512x128xf32, #tpu.memory_space<vmem>>, vector<512x128xf32>
      tpu.vector_store %arg8[%c0_11, %c0_12], %12 {strides = array<i32>} : memref<512x128xf32, #tpu.memory_space<vmem>>, vector<512x128xf32>,
    } else {
    }
    %c0 = arith.constant 0 : index
    %c0_1 = arith.constant 0 : index
    %3 = vector.load %arg8[%c0, %c0_1] : memref<512x128xf32, #tpu.memory_space<vmem>>, vector<512x128xf32>
    %c0_2 = arith.constant 0 : index
    %c0_3 = arith.constant 0 : index
    %4 = vector.load %arg3[%c0_2, %c0_3] : memref<512x392xbf16, #tpu.memory_space<vmem>>, vector<512x392xbf16>
    %c0_4 = arith.constant 0 : index
    %c0_5 = arith.constant 0 : index
    %5 = vector.load %arg4[%c0_4, %c0_5] : memref<392x128xbf16, #tpu.memory_space<vmem>>, vector<392x128xbf16>
    %cst = arith.constant dense<0.000000e+00> : vector<512x128xf32>
    %6 = tpu.matmul %4, %5, %cst {dimension_numbers = #tpu.dot_dimension_numbers<[1], [0], [0], [1], [0, 0, 1, 1], [], []>} : vector<512x392xbf16>, vector<392x128xbf16>, vector<512x128xf32> -> vector<512x128xf32>
    %7 = arith.addf %3, %6 : vector<512x128xf32>
    %c0_6 = arith.constant 0 : index
    %c0_7 = arith.constant 0 : index
    %8 = vector.load %arg8[%c0_6, %c0_7] : memref<512x128xf32, #tpu.memory_space<vmem>>, vector<512x128xf32>
    tpu.vector_store %arg8[%c0_6, %c0_7], %7 {strides = array<i32>} : memref<512x128xf32, #tpu.memory_space<vmem>>, vector<512x128xf32>,
    %c0_i32_8 = arith.constant 0 : i32
    %9 = arith.cmpi eq, %arg2, %c0_i32_8 : i32
    %10 = arith.extui %9 : i1 to i32
    %c0_i32_9 = arith.constant 0 : i32
    %11 = arith.cmpi ne, %10, %c0_i32_9 : i32
    scf.if %11 {
      %c0_10 = arith.constant 0 : index
      %c0_11 = arith.constant 0 : index
      %12 = vector.load %arg8[%c0_10, %c0_11] : memref<512x128xf32, #tpu.memory_space<vmem>>, vector<512x128xf32>
      %c0_12 = arith.constant 0 : index
      %c0_13 = arith.constant 0 : index
      %13 = vector.load %arg5[%c0_12, %c0_13] : memref<1x128xf32, #tpu.memory_space<vmem>>, vector<1x128xf32>
      %14 = vector.broadcast %13 : vector<1x128xf32> to vector<512x128xf32>
      %15 = arith.mulf %12, %14 : vector<512x128xf32>
      %c0_14 = arith.constant 0 : index
      %c0_15 = arith.constant 0 : index
      %16 = vector.load %arg6[%c0_14, %c0_15] : memref<1x128xf32, #tpu.memory_space<vmem>>, vector<1x128xf32>
      %17 = vector.broadcast %16 : vector<1x128xf32> to vector<512x128xf32>
      %18 = arith.addf %15, %17 : vector<512x128xf32>
      %cst_16 = arith.constant 0.000000e+00 : f32
      %19 = vector.broadcast %cst_16 : f32 to vector<512x128xf32>
      %20 = arith.maximumf %18, %19 : vector<512x128xf32>
      %21 = arith.truncf %20 : vector<512x128xf32> to vector<512x128xbf16>
      %c0_17 = arith.constant 0 : index
      %c0_18 = arith.constant 0 : index
      %22 = vector.load %arg7[%c0_17, %c0_18] : memref<512x128xbf16, #tpu.memory_space<vmem>>, vector<512x128xbf16>
      tpu.vector_store %arg7[%c0_17, %c0_18], %21 {strides = array<i32>} : memref<512x128xbf16, #tpu.memory_space<vmem>>, vector<512x128xbf16>,
    } else {
    }
    return
  }
  func.func @transform_0(%arg0: i32, %arg1: i32, %arg2: i32) -> (i32, i32) {
    %c0_i32 = arith.constant 0 : i32
    return %arg0, %arg2 : i32, i32
  }
  func.func @transform_1(%arg0: i32, %arg1: i32, %arg2: i32) -> (i32, i32) {
    %c0_i32 = arith.constant 0 : i32
    return %arg2, %arg1 : i32, i32
  }
  func.func @transform_2(%arg0: i32, %arg1: i32, %arg2: i32) -> (i32, i32) {
    %c0_i32 = arith.constant 0 : i32
    %c0_i32_0 = arith.constant 0 : i32
    return %c0_i32, %arg1 : i32, i32
  }
  func.func @transform_3(%arg0: i32, %arg1: i32, %arg2: i32) -> (i32, i32) {
    %c0_i32 = arith.constant 0 : i32
    %c0_i32_0 = arith.constant 0 : i32
    return %c0_i32, %arg1 : i32, i32
  }
  func.func @transform_4(%arg0: i32, %arg1: i32, %arg2: i32) -> (i32, i32) {
    %c0_i32 = arith.constant 0 : i32
    return %arg0, %arg1 : i32, i32
  }
}

</mosaic_0001>

<bundles_post_ra>
// kernel: dense_matmul_fused.1
= control target key start
LH: loop header
LB: loop body
LE: loop exit
PB: predicated region body
PF: predicated region fallthrough
CT: control target
= control target key end

     0   :  { %v3316_v1 = vmov 0   ;;  %vm1083_vm0 = vcmask 64512   ;;  %vm1180_vm1 = vcmask 1043456   ;;  %s4027_s0 = inlined_call_operand.vmem [shape: bf16[512,392], index: 0, kind: input, shape index: {}]   ;;  %s4028_s1 = inlined_call_operand.vmem [shape: bf16[392,128], index: 1, kind: input, shape index: {}]   ;;  %s4029_s2 = inlined_call_operand.vmem [shape: f32[1,128], index: 2, kind: input, shape index: {}]   ;;  %s4030_s3 = inlined_call_operand.vmem [shape: f32[1,128], index: 3, kind: input, shape index: {}]   ;;  %s4031_s4 = inlined_call_operand.hbm [shape: bf16[512,128], index: 4, kind: output, shape index: {}]  }
   0x1   :  { %v3073_v0 = vld [vmem:[%s4028_s1] sm:$0xff]   ;;  %1184 = vmatprep.subr.bf16.mxu1 %v3316_v1  ;;  %1473 = vmatprep.subr.bf16.mxu0 %v3316_v1  ;;  %v3074_v2 = vld [vmem:[%s4028_s1 + $0x8] sm:$0xff]   ;;  %v3075_v3 = vld [vmem:[%s4028_s1 + $0x10] sm:$0xff]  }
   0x2   :  { %1185 = vmatpush1.bf16.msra.mxu1 %v3073_v0  ;;  %v3080_v4 = vld [vmem:[%s4028_s1 + $0x80] sm:$0xff]   ;;  %v3082_v5 = vld [vmem:[%s4028_s1 + $0x88] sm:$0xff]   ;;  %v3076_v6 = vld [vmem:[%s4028_s1 + $0x18] sm:$0xff]  }
   0x3   :  { %1186 = vmatprep.subr.bf16.mxu1 %v3316_v1  ;;  %1474 = vmatpush1.bf16.msra.mxu0 %v3080_v4  ;;  %v3084_v7 = vld [vmem:[%s4028_s1 + $0x90] sm:$0xff]   ;;  %v3077_v8 = vld [vmem:[%s4028_s1 + $0x20] sm:$0xff]   ;;  %v3086_v9 = vld [vmem:[%s4028_s1 + $0x98] sm:$0xff]  }
   0x4   :  { %1475 = vmatprep.subr.bf16.mxu0 %v3316_v1  ;;  %v3078_v10 = vld [vmem:[%s4028_s1 + $0x28] sm:$0xff]   ;;  %v3088_v11 = vld [vmem:[%s4028_s1 + $0xa0] sm:$0xff]   ;;  %v3079_v12 = vld [vmem:[%s4028_s1 + $0x30] sm:$0xff]  }
   0x5   :  { %v3099_v13 = vld [vmem:[%s4027_s0 + $0xc] ss:$16 sps:$4 sm:$0xff]   ;;  %v3103_v16 = vld [vmem:[%s4027_s0 + $0x4] ss:$16 sps:$4 sm:$0xff]   ;;  %v3096_v21 = vld [vmem:[%s4028_s1 + $0xc0] ss:$0 sps:$4 sm:$0xff]  }
   0x6   :  { %1187 = vmatpush1.bf16.msra.mxu1 %v3074_v2  ;;  %v3090_v14 = vld [vmem:[%s4028_s1 + $0xa8] sm:$0xff]   ;;  %v3081_v15 = vld [vmem:[%s4028_s1 + $0x38] sm:$0xff]   ;;  %2652 = vmatprep.mubr.msk.bf16.mxu0 %vm1083_vm0, %v3099_v13  ;;  %v3092_v17 = vld [vmem:[%s4028_s1 + $0xb0] sm:$0xff]   ;;  %v1182_v23 = vsel %vm1180_vm1, %v3096_v21, 0 }
   0x7   :  { %1188 = vmatprep.subr.bf16.mxu1 %v3316_v1  ;;  %1476 = vmatpush1.bf16.msra.mxu0 %v3082_v5  ;;  %v3083_v18 = vld [vmem:[%s4028_s1 + $0x40] sm:$0xff]   ;;  %v3085_v19 = vld [vmem:[%s4028_s1 + $0x48] sm:$0xff]   ;;  %v3094_v20 = vld [vmem:[%s4028_s1 + $0xb8] sm:$0xff]  }
   0x8   :  { %1477 = vmatprep.subr.bf16.mxu0 %v3316_v1  ;;  %1216 = vmatprep.mubr.bf16.mxu1 %v3103_v16  ;;  %v3087_v22 = vld [vmem:[%s4028_s1 + $0x50] sm:$0xff]   ;;  %v3097_v24 = vld [vmem:[%s4027_s0 + $0x8] ss:$16 sps:$4 sm:$0xff]   ;;  %v3104_v25 = vld [vmem:[%s4027_s0 + $0x2c] ss:$16 sps:$4 sm:$0xff]  }
   0x9   :  { %v3089_v26 = vld [vmem:[%s4028_s1 + $0x58] sm:$0xff]   ;;  %v3091_v27 = vld [vmem:[%s4028_s1 + $0x60] sm:$0xff]   ;;  %v3093_v30 = vld [vmem:[%s4028_s1 + $0x68] sm:$0xff]  }
   0xa   :  { %1189 = vmatpush1.bf16.msra.mxu1 %v3075_v3  ;;  %v3106_v28 = vld [vmem:[%s4027_s0 + $0x28] ss:$16 sps:$4 sm:$0xff]   ;;  %v3110_v29 = vld [vmem:[%s4027_s0 + $0x4c] ss:$16 sps:$4 sm:$0xff]   ;;  %v3095_v31 = vld [vmem:[%s4028_s1 + $0x70] sm:$0xff]  }
   0xb   :  { %1190 = vmatprep.subr.bf16.mxu1 %v3316_v1  ;;  %1478 = vmatpush1.bf16.msra.mxu0 %v3084_v7  ;;  %v3112_v32 = vld [vmem:[%s4027_s0 + $0x48] ss:$16 sps:$4 sm:$0xff]   ;;  %v3116_v33 = vld [vmem:[%s4027_s0 + $0x6c] ss:$16 sps:$4 sm:$0xff]   ;;  %v3101_v35 = vld [vmem:[%s4027_s0] ss:$16 sps:$4 sm:$0xff]  }
   0xc   :  { %1479 = vmatprep.subr.bf16.mxu0 %v3316_v1  ;;  %v3100_v34 = vld [vmem:[%s4028_s1 + $0x78] sm:$0xff]   ;;  %v3107_v36 = vld [vmem:[%s4027_s0 + $0x24] ss:$16 sps:$4 sm:$0xff]   ;;  %v3109_v39 = vld [vmem:[%s4027_s0 + $0x20] ss:$16 sps:$4 sm:$0xff]  }
   0xd   :  { %v3118_v37 = vld [vmem:[%s4027_s0 + $0x68] ss:$16 sps:$4 sm:$0xff]   ;;  %v3122_v38 = vld [vmem:[%s4027_s0 + $0x8c] ss:$16 sps:$4 sm:$0xff]   ;;  %v3113_v40 = vld [vmem:[%s4027_s0 + $0x44] ss:$16 sps:$4 sm:$0xff]  }
   0xe   :  { %1191 = vmatpush1.bf16.msra.mxu1 %v3076_v6  ;;  %v3124_v41 = vld [vmem:[%s4027_s0 + $0x88] ss:$16 sps:$4 sm:$0xff]   ;;  %v3128_v42 = vld [vmem:[%s4027_s0 + $0xac] ss:$16 sps:$4 sm:$0xff]   ;;  %v3115_v43 = vld [vmem:[%s4027_s0 + $0x40] ss:$16 sps:$4 sm:$0xff]  }
   0xf   :  { %1192 = vmatprep.subr.bf16.mxu1 %v3316_v1  ;;  %1480 = vmatpush1.bf16.msra.mxu0 %v3086_v9  ;;  %v3119_v44 = vld [vmem:[%s4027_s0 + $0x64] ss:$16 sps:$4 sm:$0xff]   ;;  %v3130_v45 = vld [vmem:[%s4027_s0 + $0xa8] ss:$16 sps:$4 sm:$0xff]   ;;  %v3134_v46 = vld [vmem:[%s4027_s0 + $0xcc] ss:$16 sps:$4 sm:$0xff]  }
  0x10   :  { %1481 = vmatprep.subr.bf16.mxu0 %v3316_v1  ;;  %v3121_v47 = vld [vmem:[%s4027_s0 + $0x60] ss:$16 sps:$4 sm:$0xff]   ;;  %v3125_v48 = vld [vmem:[%s4027_s0 + $0x84] ss:$16 sps:$4 sm:$0xff]   ;;  %v3136_v49 = vld [vmem:[%s4027_s0 + $0xc8] ss:$16 sps:$4 sm:$0xff]  }
  0x11   :  { %v3140_v50 = vld [vmem:[%s4027_s0 + $0xec] ss:$16 sps:$4 sm:$0xff]   ;;  %v3127_v51 = vld [vmem:[%s4027_s0 + $0x80] ss:$16 sps:$4 sm:$0xff]   ;;  %v3131_v52 = vld [vmem:[%s4027_s0 + $0xa4] ss:$16 sps:$4 sm:$0xff]  }
  0x12   :  { %1193 = vmatpush1.bf16.msra.mxu1 %v3077_v8 }
  0x13   :  { %1194 = vmatprep.subr.bf16.mxu1 %v3316_v1  ;;  %1482 = vmatpush1.bf16.msra.mxu0 %v3088_v11 }
  0x14   :  { %1483 = vmatprep.subr.bf16.mxu0 %v3316_v1 }
  0x16   :  { %1195 = vmatpush1.bf16.msra.mxu1 %v3078_v10 }
  0x17   :  { %1196 = vmatprep.subr.bf16.mxu1 %v3316_v1  ;;  %1484 = vmatpush1.bf16.msra.mxu0 %v3090_v14 }
  0x18   :  { %1485 = vmatprep.subr.bf16.mxu0 %v3316_v1 }
  0x1a   :  { %1197 = vmatpush1.bf16.msra.mxu1 %v3079_v12 }
  0x1b   :  { %1198 = vmatprep.subr.bf16.mxu1 %v3316_v1  ;;  %1486 = vmatpush1.bf16.msra.mxu0 %v3092_v17 }
  0x1c   :  { %1487 = vmatprep.subr.bf16.mxu0 %v3316_v1 }
  0x1e   :  { %1199 = vmatpush1.bf16.msra.mxu1 %v3081_v15 }
  0x1f   :  { %1200 = vmatprep.subr.bf16.mxu1 %v3316_v1  ;;  %1488 = vmatpush1.bf16.msra.mxu0 %v3094_v20 }
  0x20   :  { %1489 = vmatprep.subr.bf16.mxu0 %v3316_v1 }
  0x22   :  { %1201 = vmatpush1.bf16.msra.mxu1 %v3083_v18 }
  0x23   :  { %1202 = vmatprep.subr.bf16.mxu1 %v3316_v1  ;;  %1490 = vmatpush1.bf16.msra.mxu0 %v1182_v23 }
  0x26   :  { %1203 = vmatpush1.bf16.msra.mxu1 %v3085_v19  ;;  %1506 = vmatmul.mubr.bf16.vlgmr.msra.gmra.mrb[0].mxu0 %v3097_v24 }
  0x27   :  { %1204 = vmatprep.subr.bf16.mxu1 %v3316_v1  ;;  %2653 = vmatprep.mubr.msk.bf16.mxu0 %vm1083_vm0, %v3104_v25 }
  0x2a   :  { %1205 = vmatpush1.bf16.msra.mxu1 %v3087_v22 }
  0x2b   :  { %1206 = vmatprep.subr.bf16.mxu1 %v3316_v1 }
  0x2e   :  { %1207 = vmatpush1.bf16.msra.mxu1 %v3089_v26  ;;  %1514 = vmatmul.mubr.bf16.gmra.mrb[4].mxu0 %v3106_v28 }
  0x2f   :  { %1208 = vmatprep.subr.bf16.mxu1 %v3316_v1  ;;  %2654 = vmatprep.mubr.msk.bf16.mxu0 %vm1083_vm0, %v3110_v29 }
  0x32   :  { %1209 = vmatpush1.bf16.msra.mxu1 %v3091_v27 }
  0x33   :  { %1210 = vmatprep.subr.bf16.mxu1 %v3316_v1 }
  0x36   :  { %1211 = vmatpush1.bf16.msra.mxu1 %v3093_v30  ;;  %1522 = vmatmul.mubr.bf16.gmra.mrb[8].mxu0 %v3112_v32 }
  0x37   :  { %1212 = vmatprep.subr.bf16.mxu1 %v3316_v1  ;;  %2655 = vmatprep.mubr.msk.bf16.mxu0 %vm1083_vm0, %v3116_v33 }
  0x3a   :  { %1213 = vmatpush1.bf16.msra.mxu1 %v3095_v31 }
  0x3b   :  { %1214 = vmatprep.subr.bf16.mxu1 %v3316_v1 }
  0x3e   :  { %1215 = vmatpush1.bf16.msra.mxu1 %v3100_v34  ;;  %1530 = vmatmul.mubr.bf16.gmra.mrb[12].mxu0 %v3118_v37 }
  0x3f   :  { %2656 = vmatprep.mubr.msk.bf16.mxu0 %vm1083_vm0, %v3122_v38 }
  0x41   :  { %1217 = vmatmul.mubr.bf16.vlgmr.msra.gmra.mrb[0].mxu1 %v3101_v35 }
  0x42   :  { %1224 = vmatprep.mubr.bf16.mxu1 %v3107_v36 }
  0x46   :  { %1538 = vmatmul.mubr.bf16.gmra.mrb[16].mxu0 %v3124_v41 }
  0x47   :  { %2657 = vmatprep.mubr.msk.bf16.mxu0 %vm1083_vm0, %v3128_v42 }
  0x49   :  { %1225 = vmatmul.mubr.bf16.gmra.mrb[4].mxu1 %v3109_v39 }
  0x4a   :  { %1232 = vmatprep.mubr.bf16.mxu1 %v3113_v40 }
  0x4e   :  { %1546 = vmatmul.mubr.bf16.gmra.mrb[20].mxu0 %v3130_v45 }
  0x4f   :  { %2658 = vmatprep.mubr.msk.bf16.mxu0 %vm1083_vm0, %v3134_v46 }
  0x51   :  { %1233 = vmatmul.mubr.bf16.gmra.mrb[8].mxu1 %v3115_v43 }
  0x52   :  { %1240 = vmatprep.mubr.bf16.mxu1 %v3119_v44 }
  0x56   :  { %1554 = vmatmul.mubr.bf16.gmra.mrb[24].mxu0 %v3136_v49 }
  0x57   :  { %2659 = vmatprep.mubr.msk.bf16.mxu0 %vm1083_vm0, %v3140_v50 }
  0x59   :  { %1241 = vmatmul.mubr.bf16.gmra.mrb[12].mxu1 %v3121_v47 }
  0x5a   :  { %1248 = vmatprep.mubr.bf16.mxu1 %v3125_v48 }
  0x5b   :  { %9 = vsyncpa [#allocation4], 0  ;;  %v3142_v53 = vld [vmem:[%s4027_s0 + $0xe8] ss:$16 sps:$4 sm:$0xff]   ;;  %v3146_v54 = vld [vmem:[%s4027_s0 + $0x10c] ss:$16 sps:$4 sm:$0xff]  }
  0x5c   :  { %v3133_v55 = vld [vmem:[%s4027_s0 + $0xa0] ss:$16 sps:$4 sm:$0xff]   ;;  %v3137_v56 = vld [vmem:[%s4027_s0 + $0xc4] ss:$16 sps:$4 sm:$0xff]   ;;  %v3148_v57 = vld [vmem:[%s4027_s0 + $0x108] ss:$16 sps:$4 sm:$0xff]  }
  0x5d   :  { %v3152_v58 = vld [vmem:[%s4027_s0 + $0x12c] ss:$16 sps:$4 sm:$0xff]   ;;  %v3139_v59 = vld [vmem:[%s4027_s0 + $0xc0] ss:$16 sps:$4 sm:$0xff]   ;;  %v3143_v60 = vld [vmem:[%s4027_s0 + $0xe4] ss:$16 sps:$4 sm:$0xff]  }
  0x5e   :  { %1562 = vmatmul.mubr.bf16.gmra.mrb[28].mxu0 %v3142_v53  ;;  %v3154_v61 = vld [vmem:[%s4027_s0 + $0x128] ss:$16 sps:$4 sm:$0xff]   ;;  %v3158_v62 = vld [vmem:[%s4027_s0 + $0x14c] ss:$16 sps:$4 sm:$0xff]   ;;  %v3145_v63 = vld [vmem:[%s4027_s0 + $0xe0] ss:$16 sps:$4 sm:$0xff]  }
  0x5f   :  { %2660 = vmatprep.mubr.msk.bf16.mxu0 %vm1083_vm0, %v3146_v54  ;;  %v3149_v0 = vld [vmem:[%s4027_s0 + $0x104] ss:$16 sps:$4 sm:$0xff]   ;;  %v3160_v1 = vld [vmem:[%s4027_s0 + $0x148] ss:$16 sps:$4 sm:$0xff]   ;;  %v3164_v2 = vld [vmem:[%s4027_s0 + $0x16c] ss:$16 sps:$4 sm:$0xff]  }
  0x60   :  { %v3151_v3 = vld [vmem:[%s4027_s0 + $0x100] ss:$16 sps:$4 sm:$0xff]   ;;  %v3155_v4 = vld [vmem:[%s4027_s0 + $0x124] ss:$16 sps:$4 sm:$0xff]   ;;  %v3166_v5 = vld [vmem:[%s4027_s0 + $0x168] ss:$16 sps:$4 sm:$0xff]  }
  0x61   :  { %1249 = vmatmul.mubr.bf16.gmra.mrb[16].mxu1 %v3127_v51  ;;  %v3170_v6 = vld [vmem:[%s4027_s0 + $0x18c] ss:$16 sps:$4 sm:$0xff]   ;;  %v3157_v7 = vld [vmem:[%s4027_s0 + $0x120] ss:$16 sps:$4 sm:$0xff]   ;;  %v3161_v8 = vld [vmem:[%s4027_s0 + $0x144] ss:$16 sps:$4 sm:$0xff]  }
  0x62   :  { %1256 = vmatprep.mubr.bf16.mxu1 %v3131_v52  ;;  %v3172_v9 = vld [vmem:[%s4027_s0 + $0x188] ss:$16 sps:$4 sm:$0xff]   ;;  %v3176_v10 = vld [vmem:[%s4027_s0 + $0x1ac] ss:$16 sps:$4 sm:$0xff]   ;;  %v3163_v11 = vld [vmem:[%s4027_s0 + $0x140] ss:$16 sps:$4 sm:$0xff]  }
  0x63   :  { %v3167_v12 = vld [vmem:[%s4027_s0 + $0x164] ss:$16 sps:$4 sm:$0xff]   ;;  %v3178_v13 = vld [vmem:[%s4027_s0 + $0x1a8] ss:$16 sps:$4 sm:$0xff]   ;;  %v3182_v14 = vld [vmem:[%s4027_s0 + $0x1cc] ss:$16 sps:$4 sm:$0xff]  }
  0x64   :  { %v3169_v15 = vld [vmem:[%s4027_s0 + $0x160] ss:$16 sps:$4 sm:$0xff]   ;;  %v3173_v16 = vld [vmem:[%s4027_s0 + $0x184] ss:$16 sps:$4 sm:$0xff]   ;;  %v3184_v17 = vld [vmem:[%s4027_s0 + $0x1c8] ss:$16 sps:$4 sm:$0xff]  }
  0x65   :  { %v3188_v18 = vld [vmem:[%s4027_s0 + $0x1ec] ss:$16 sps:$4 sm:$0xff]   ;;  %v3175_v19 = vld [vmem:[%s4027_s0 + $0x180] ss:$16 sps:$4 sm:$0xff]   ;;  %v3179_v20 = vld [vmem:[%s4027_s0 + $0x1a4] ss:$16 sps:$4 sm:$0xff]  }
  0x66   :  { %1570 = vmatmul.mubr.bf16.gmra.mrb[32].mxu0 %v3148_v57  ;;  %v3190_v21 = vld [vmem:[%s4027_s0 + $0x1e8] ss:$16 sps:$4 sm:$0xff]   ;;  %v3194_v22 = vld [vmem:[%s4027_s0 + $0x20c] ss:$16 sps:$4 sm:$0xff]   ;;  %v3181_v23 = vld [vmem:[%s4027_s0 + $0x1a0] ss:$16 sps:$4 sm:$0xff]  }
  0x67   :  { %2661 = vmatprep.mubr.msk.bf16.mxu0 %vm1083_vm0, %v3152_v58  ;;  %v3185_v24 = vld [vmem:[%s4027_s0 + $0x1c4] ss:$16 sps:$4 sm:$0xff]   ;;  %v3196_v25 = vld [vmem:[%s4027_s0 + $0x208] ss:$16 sps:$4 sm:$0xff]   ;;  %v3200_v26 = vld [vmem:[%s4027_s0 + $0x22c] ss:$16 sps:$4 sm:$0xff]  }
  0x68   :  { %v3187_v27 = vld [vmem:[%s4027_s0 + $0x1c0] ss:$16 sps:$4 sm:$0xff]   ;;  %v3191_v28 = vld [vmem:[%s4027_s0 + $0x1e4] ss:$16 sps:$4 sm:$0xff]   ;;  %v3202_v29 = vld [vmem:[%s4027_s0 + $0x228] ss:$16 sps:$4 sm:$0xff]  }
  0x69   :  { %1257 = vmatmul.mubr.bf16.gmra.mrb[20].mxu1 %v3133_v55  ;;  %v3206_v30 = vld [vmem:[%s4027_s0 + $0x24c] ss:$16 sps:$4 sm:$0xff]   ;;  %v3193_v31 = vld [vmem:[%s4027_s0 + $0x1e0] ss:$16 sps:$4 sm:$0xff]   ;;  %v3197_v32 = vld [vmem:[%s4027_s0 + $0x204] ss:$16 sps:$4 sm:$0xff]  }
  0x6a   :  { %1264 = vmatprep.mubr.bf16.mxu1 %v3137_v56  ;;  %v3208_v33 = vld [vmem:[%s4027_s0 + $0x248] ss:$16 sps:$4 sm:$0xff]   ;;  %v3212_v34 = vld [vmem:[%s4027_s0 + $0x26c] ss:$16 sps:$4 sm:$0xff]   ;;  %v3199_v35 = vld [vmem:[%s4027_s0 + $0x200] ss:$16 sps:$4 sm:$0xff]  }
  0x6b   :  { %v3203_v36 = vld [vmem:[%s4027_s0 + $0x224] ss:$16 sps:$4 sm:$0xff]   ;;  %v3214_v37 = vld [vmem:[%s4027_s0 + $0x268] ss:$16 sps:$4 sm:$0xff]   ;;  %v3218_v38 = vld [vmem:[%s4027_s0 + $0x28c] ss:$16 sps:$4 sm:$0xff]  }
  0x6c   :  { %v3205_v39 = vld [vmem:[%s4027_s0 + $0x220] ss:$16 sps:$4 sm:$0xff]   ;;  %v3209_v40 = vld [vmem:[%s4027_s0 + $0x244] ss:$16 sps:$4 sm:$0xff]   ;;  %v3220_v41 = vld [vmem:[%s4027_s0 + $0x288] ss:$16 sps:$4 sm:$0xff]  }
  0x6d   :  { %v3224_v42 = vld [vmem:[%s4027_s0 + $0x2ac] ss:$16 sps:$4 sm:$0xff]   ;;  %v3211_v43 = vld [vmem:[%s4027_s0 + $0x240] ss:$16 sps:$4 sm:$0xff]   ;;  %v3215_v44 = vld [vmem:[%s4027_s0 + $0x264] ss:$16 sps:$4 sm:$0xff]  }
  0x6e   :  { %1578 = vmatmul.mubr.bf16.gmra.mrb[36].mxu0 %v3154_v61  ;;  %v3226_v45 = vld [vmem:[%s4027_s0 + $0x2a8] ss:$16 sps:$4 sm:$0xff]   ;;  %v3230_v46 = vld [vmem:[%s4027_s0 + $0x2cc] ss:$16 sps:$4 sm:$0xff]   ;;  %v3217_v47 = vld [vmem:[%s4027_s0 + $0x260] ss:$16 sps:$4 sm:$0xff]  }
  0x6f   :  { %2662 = vmatprep.mubr.msk.bf16.mxu0 %vm1083_vm0, %v3158_v62  ;;  %v3221_v48 = vld [vmem:[%s4027_s0 + $0x284] ss:$16 sps:$4 sm:$0xff]   ;;  %v3232_v49 = vld [vmem:[%s4027_s0 + $0x2c8] ss:$16 sps:$4 sm:$0xff]   ;;  %v3236_v50 = vld [vmem:[%s4027_s0 + $0x2ec] ss:$16 sps:$4 sm:$0xff]  }
  0x70   :  { %v3223_v51 = vld [vmem:[%s4027_s0 + $0x280] ss:$16 sps:$4 sm:$0xff]   ;;  %v3227_v52 = vld [vmem:[%s4027_s0 + $0x2a4] ss:$16 sps:$4 sm:$0xff]   ;;  %v3238_v53 = vld [vmem:[%s4027_s0 + $0x2e8] ss:$16 sps:$4 sm:$0xff]  }
  0x71   :  { %1265 = vmatmul.mubr.bf16.gmra.mrb[24].mxu1 %v3139_v59  ;;  %v3242_v54 = vld [vmem:[%s4027_s0 + $0x30c] ss:$16 sps:$4 sm:$0xff]   ;;  %v3229_v55 = vld [vmem:[%s4027_s0 + $0x2a0] ss:$16 sps:$4 sm:$0xff]   ;;  %v3233_v56 = vld [vmem:[%s4027_s0 + $0x2c4] ss:$16 sps:$4 sm:$0xff]  }
  0x72   :  { %1272 = vmatprep.mubr.bf16.mxu1 %v3143_v60  ;;  %v3244_v57 = vld [vmem:[%s4027_s0 + $0x308] ss:$16 sps:$4 sm:$0xff]   ;;  %v3248_v58 = vld [vmem:[%s4027_s0 + $0x32c] ss:$16 sps:$4 sm:$0xff]   ;;  %v3235_v59 = vld [vmem:[%s4027_s0 + $0x2c0] ss:$16 sps:$4 sm:$0xff]  }
  0x73   :  { %v3239_v60 = vld [vmem:[%s4027_s0 + $0x2e4] ss:$16 sps:$4 sm:$0xff]   ;;  %v3250_v61 = vld [vmem:[%s4027_s0 + $0x328] ss:$16 sps:$4 sm:$0xff]   ;;  %v3254_v62 = vld [vmem:[%s4027_s0 + $0x34c] ss:$16 sps:$4 sm:$0xff]  }
  0x76   :  { %1586 = vmatmul.mubr.bf16.gmra.mrb[40].mxu0 %v3160_v1  ;;  %v3256_v1 = vld [vmem:[%s4027_s0 + $0x348] ss:$16 sps:$4 sm:$0xff]  }
  0x77   :  { %2663 = vmatprep.mubr.msk.bf16.mxu0 %vm1083_vm0, %v3164_v2  ;;  %v3260_v2 = vld [vmem:[%s4027_s0 + $0x36c] ss:$16 sps:$4 sm:$0xff]  }
  0x79   :  { %1273 = vmatmul.mubr.bf16.gmra.mrb[28].mxu1 %v3145_v63  ;;  %v3241_v63 = vld [vmem:[%s4027_s0 + $0x2e0] ss:$16 sps:$4 sm:$0xff]  }
  0x7a   :  { %1280 = vmatprep.mubr.bf16.mxu1 %v3149_v0  ;;  %v3245_v0 = vld [vmem:[%s4027_s0 + $0x304] ss:$16 sps:$4 sm:$0xff]  }
  0x7e   :  { %1594 = vmatmul.mubr.bf16.gmra.mrb[44].mxu0 %v3166_v5 }
  0x7f   :  { %2664 = vmatprep.mubr.msk.bf16.mxu0 %vm1083_vm0, %v3170_v6 }
  0x81   :  { %1281 = vmatmul.mubr.bf16.gmra.mrb[32].mxu1 %v3151_v3  ;;  %v3247_v3 = vld [vmem:[%s4027_s0 + $0x300] ss:$16 sps:$4 sm:$0xff]  }
  0x82   :  { %1288 = vmatprep.mubr.bf16.mxu1 %v3155_v4  ;;  %v3251_v4 = vld [vmem:[%s4027_s0 + $0x324] ss:$16 sps:$4 sm:$0xff]  }
  0x86   :  { %1602 = vmatmul.mubr.bf16.gmra.mrb[48].mxu0 %v3172_v9  ;;  %v3266_v9 = vld [vmem:[%s4027_s0 + $0x38c] ss:$16 sps:$4 sm:$0xff]  }
  0x87   :  { %2665 = vmatprep.mubr.msk.bf16.mxu0 %vm1083_vm0, %v3176_v10 }
  0x89   :  { %1289 = vmatmul.mubr.bf16.gmra.mrb[36].mxu1 %v3157_v7  ;;  %v3262_v7 = vld [vmem:[%s4027_s0 + $0x368] ss:$16 sps:$4 sm:$0xff]  }
  0x8a   :  { %1296 = vmatprep.mubr.bf16.mxu1 %v3161_v8 }
  0x8e   :  { %1610 = vmatmul.mubr.bf16.gmra.mrb[52].mxu0 %v3178_v13 }
  0x8f   :  { %2666 = vmatprep.mubr.msk.bf16.mxu0 %vm1083_vm0, %v3182_v14 }
  0x91   :  { %1297 = vmatmul.mubr.bf16.gmra.mrb[40].mxu1 %v3163_v11  ;;  %v3253_v11 = vld [vmem:[%s4027_s0 + $0x320] ss:$16 sps:$4 sm:$0xff]  }
  0x92   :  { %1304 = vmatprep.mubr.bf16.mxu1 %v3167_v12  ;;  %v3257_v12 = vld [vmem:[%s4027_s0 + $0x344] ss:$16 sps:$4 sm:$0xff]  }
  0x96   :  { %1618 = vmatmul.mubr.bf16.gmra.mrb[56].mxu0 %v3184_v17  ;;  %v3272_v17 = vld [vmem:[%s4027_s0 + $0x3ac] ss:$16 sps:$4 sm:$0xff]  }
  0x97   :  { %2667 = vmatprep.mubr.msk.bf16.mxu0 %vm1083_vm0, %v3188_v18 }
  0x99   :  { %1305 = vmatmul.mubr.bf16.gmra.mrb[44].mxu1 %v3169_v15  ;;  %v3268_v15 = vld [vmem:[%s4027_s0 + $0x388] ss:$16 sps:$4 sm:$0xff]  }
  0x9a   :  { %1312 = vmatprep.mubr.bf16.mxu1 %v3173_v16 }
  0x9e   :  { %1626 = vmatmul.mubr.bf16.gmra.mrb[60].mxu0 %v3190_v21 }
  0x9f   :  { %2668 = vmatprep.mubr.msk.bf16.mxu0 %vm1083_vm0, %v3194_v22 }
  0xa1   :  { %1313 = vmatmul.mubr.bf16.gmra.mrb[48].mxu1 %v3175_v19  ;;  %v3259_v19 = vld [vmem:[%s4027_s0 + $0x340] ss:$16 sps:$4 sm:$0xff]  }
  0xa2   :  { %1320 = vmatprep.mubr.bf16.mxu1 %v3179_v20  ;;  %v3263_v20 = vld [vmem:[%s4027_s0 + $0x364] ss:$16 sps:$4 sm:$0xff]  }
  0xa6   :  { %1634 = vmatmul.mubr.bf16.gmra.mrb[64].mxu0 %v3196_v25  ;;  %v3278_v25 = vld [vmem:[%s4027_s0 + $0x3cc] ss:$16 sps:$4 sm:$0xff]  }
  0xa7   :  { %2669 = vmatprep.mubr.msk.bf16.mxu0 %vm1083_vm0, %v3200_v26 }
  0xa9   :  { %1321 = vmatmul.mubr.bf16.gmra.mrb[52].mxu1 %v3181_v23  ;;  %v3274_v23 = vld [vmem:[%s4027_s0 + $0x3a8] ss:$16 sps:$4 sm:$0xff]  }
  0xaa   :  { %1328 = vmatprep.mubr.bf16.mxu1 %v3185_v24 }
  0xae   :  { %1642 = vmatmul.mubr.bf16.gmra.mrb[68].mxu0 %v3202_v29 }
  0xaf   :  { %2670 = vmatprep.mubr.msk.bf16.mxu0 %vm1083_vm0, %v3206_v30 }
  0xb1   :  { %1329 = vmatmul.mubr.bf16.gmra.mrb[56].mxu1 %v3187_v27 }
  0xb2   :  { %1336 = vmatprep.mubr.bf16.mxu1 %v3191_v28  ;;  %v3828_v28 = vld [vmem:[%s4029_s2] ss:$0 sm:$0xff] }
  0xb6   :  { %1650 = vmatmul.mubr.bf16.gmra.mrb[72].mxu0 %v3208_v33 }
  0xb7   :  { %2671 = vmatprep.mubr.msk.bf16.mxu0 %vm1083_vm0, %v3212_v34  ;;  %v3269_v34 = vld [vmem:[%s4027_s0 + $0x384] ss:$16 sps:$4 sm:$0xff]  }
  0xb9   :  { %1337 = vmatmul.mubr.bf16.gmra.mrb[60].mxu1 %v3193_v31  ;;  %v3265_v31 = vld [vmem:[%s4027_s0 + $0x360] ss:$16 sps:$4 sm:$0xff]  }
  0xba   :  { %1344 = vmatprep.mubr.bf16.mxu1 %v3197_v32  ;;  %v3837_v32 = vld [vmem:[%s4030_s3] ss:$0 sm:$0xff] }
  0xbe   :  { %1658 = vmatmul.mubr.bf16.gmra.mrb[76].mxu0 %v3214_v37 }
  0xbf   :  { %2672 = vmatprep.mubr.msk.bf16.mxu0 %vm1083_vm0, %v3218_v38 }
  0xc1   :  { %1345 = vmatmul.mubr.bf16.gmra.mrb[64].mxu1 %v3199_v35 }
  0xc2   :  { %1352 = vmatprep.mubr.bf16.mxu1 %v3203_v36 }
  0xc6   :  { %1666 = vmatmul.mubr.bf16.gmra.mrb[80].mxu0 %v3220_v41 }
  0xc7   :  { %2673 = vmatprep.mubr.msk.bf16.mxu0 %vm1083_vm0, %v3224_v42 }
  0xc9   :  { %1353 = vmatmul.mubr.bf16.gmra.mrb[68].mxu1 %v3205_v39 }
  0xca   :  { %1360 = vmatprep.mubr.bf16.mxu1 %v3209_v40  ;;  %v3280_v40 = vld [vmem:[%s4027_s0 + $0x3c8] ss:$16 sps:$4 sm:$0xff]  }
  0xce   :  { %1674 = vmatmul.mubr.bf16.gmra.mrb[84].mxu0 %v3226_v45 }
  0xcf   :  { %2674 = vmatprep.mubr.msk.bf16.mxu0 %vm1083_vm0, %v3230_v46 }
  0xd1   :  { %1361 = vmatmul.mubr.bf16.gmra.mrb[72].mxu1 %v3211_v43 }
  0xd2   :  { %1368 = vmatprep.mubr.bf16.mxu1 %v3215_v44  ;;  %v3284_v44 = vld [vmem:[%s4027_s0 + $0x3ec] ss:$16 sps:$4 sm:$0xff]  }
  0xd6   :  { %1682 = vmatmul.mubr.bf16.gmra.mrb[88].mxu0 %v3232_v49 }
  0xd7   :  { %2675 = vmatprep.mubr.msk.bf16.mxu0 %vm1083_vm0, %v3236_v50 }
  0xd9   :  { %1369 = vmatmul.mubr.bf16.gmra.mrb[76].mxu1 %v3217_v47 }
  0xda   :  { %1376 = vmatprep.mubr.bf16.mxu1 %v3221_v48 }
  0xde   :  { %1690 = vmatmul.mubr.bf16.gmra.mrb[92].mxu0 %v3238_v53 }
  0xdf   :  { %2676 = vmatprep.mubr.msk.bf16.mxu0 %vm1083_vm0, %v3242_v54  ;;  %v3275_v54 = vld [vmem:[%s4027_s0 + $0x3a4] ss:$16 sps:$4 sm:$0xff]  }
  0xe1   :  { %1377 = vmatmul.mubr.bf16.gmra.mrb[80].mxu1 %v3223_v51 }
  0xe2   :  { %1384 = vmatprep.mubr.bf16.mxu1 %v3227_v52  ;;  %v3271_v52 = vld [vmem:[%s4027_s0 + $0x380] ss:$16 sps:$4 sm:$0xff]  }
  0xe6   :  { %1698 = vmatmul.mubr.bf16.gmra.mrb[96].mxu0 %v3244_v57 }
  0xe7   :  { %2677 = vmatprep.mubr.msk.bf16.mxu0 %vm1083_vm0, %v3248_v58 }
  0xe9   :  { %1385 = vmatmul.mubr.bf16.gmra.mrb[84].mxu1 %v3229_v55 }
  0xea   :  { %1392 = vmatprep.mubr.bf16.mxu1 %v3233_v56 }
  0xee   :  { %1706 = vmatmul.mubr.bf16.gmra.mrb[100].mxu0 %v3250_v61  ;;  %v3286_v61 = vld [vmem:[%s4027_s0 + $0x3e8] ss:$16 sps:$4 sm:$0xff]  }
  0xef   :  { %2678 = vmatprep.mubr.msk.bf16.mxu0 %vm1083_vm0, %v3254_v62 }
  0xf1   :  { %1393 = vmatmul.mubr.bf16.gmra.mrb[88].mxu1 %v3235_v59 }
  0xf2   :  { %1400 = vmatprep.mubr.bf16.mxu1 %v3239_v60 }
  0xf6   :  { %1714 = vmatmul.mubr.bf16.gmra.mrb[104].mxu0 %v3256_v1 }
  0xf7   :  { %2679 = vmatprep.mubr.msk.bf16.mxu0 %vm1083_vm0, %v3260_v2 }
  0xf9   :  { %1401 = vmatmul.mubr.bf16.gmra.mrb[92].mxu1 %v3241_v63  ;;  %v1507_v5 = vpop.f32.mrb[0].mxu0 }
  0xfa   :  { %1408 = vmatprep.mubr.bf16.mxu1 %v3245_v0  ;;  %v1509_v6 = vpop.f32.mrb[1].mxu0 }
  0xfb   :  { %v1510_v8 = vpop.f32.mrb[2].mxu0 }
  0xfc   :  { %v1512_v10 = vpop.f32.mrb[3].mxu0 }
  0xfd   :  { %v3281_v10 = vld [vmem:[%s4027_s0 + $0x3c4] ss:$16 sps:$4 sm:$0xff]  }
  0xfe   :  { %1722 = vmatmul.mubr.bf16.gmra.mrb[108].mxu0 %v3262_v7 }
  0xff   :  { %2680 = vmatprep.mubr.msk.bf16.mxu0 %vm1083_vm0, %v3266_v9 }
 0x101   :  { %1409 = vmatmul.mubr.bf16.gmra.mrb[96].mxu1 %v3247_v3  ;;  %v1515_v13 = vpop.f32.mrb[4].mxu0 }
 0x102   :  { %1416 = vmatprep.mubr.bf16.mxu1 %v3251_v4  ;;  %v1517_v14 = vpop.f32.mrb[5].mxu0 }
 0x103   :  { %v1518_v16 = vpop.f32.mrb[6].mxu0 }
 0x104   :  { %v1520_v18 = vpop.f32.mrb[7].mxu0 }
 0x106   :  { %1730 = vmatmul.mubr.bf16.gmra.mrb[112].mxu0 %v3268_v15 }
 0x107   :  { %2681 = vmatprep.mubr.msk.bf16.mxu0 %vm1083_vm0, %v3272_v17 }
 0x109   :  { %1417 = vmatmul.mubr.bf16.gmra.mrb[100].mxu1 %v3253_v11  ;;  %v1523_v21 = vpop.f32.mrb[8].mxu0 }
 0x10a   :  { %1424 = vmatprep.mubr.bf16.mxu1 %v3257_v12  ;;  %v1525_v22 = vpop.f32.mrb[9].mxu0 }
 0x10b   :  { %v3820_v24 = vpop.f32.mrb[10].mxu0 }
 0x10c   :  { %v1528_v26 = vpop.f32.mrb[11].mxu0 }
 0x10e   :  { %1738 = vmatmul.mubr.bf16.gmra.mrb[116].mxu0 %v3274_v23 }
 0x10f   :  { %2682 = vmatprep.mubr.msk.bf16.mxu0 %vm1083_vm0, %v3278_v25 }
 0x111   :  { %1425 = vmatmul.mubr.bf16.gmra.mrb[104].mxu1 %v3259_v19  ;;  %v1531_v38 = vpop.f32.mrb[12].mxu0 }
 0x112   :  { %1432 = vmatprep.mubr.bf16.mxu1 %v3263_v20  ;;  %v1533_v39 = vpop.f32.mrb[13].mxu0 }
 0x113   :  { %v3848_v43 = vpop.f32.mrb[14].mxu0 }
 0x114   :  { %v1218_v27 = vpop.f32.mrb[0].mxu1  ;;  %v1536_v45 = vpop.f32.mrb[15].mxu0 }
 0x115   :  { %v1508_v29 = vadd.f32 %v1507_v5, %v1218_v27  ;;  %v1220_v30 = vpop.f32.mrb[1].mxu1 }
 0x116   :  { %v1221_v33 = vpop.f32.mrb[2].mxu1  ;;  %1746 = vmatmul.mubr.bf16.gmra.mrb[120].mxu0 %v3280_v40  ;;  %v3287_v30 = vld [vmem:[%s4027_s0 + $0x3e4] ss:$16 sps:$4 sm:$0xff]  }
 0x117   :  { %v1964_v35 = vmul.f32 %v3828_v28, %v1508_v29  ;;  %v1511_v36 = vadd.f32 %v1510_v8, %v1221_v33  ;;  %v1223_v37 = vpop.f32.mrb[3].mxu1  ;;  %2683 = vmatprep.mubr.msk.bf16.mxu0 %vm1083_vm0, %v3284_v44  ;;  %v3277_v8 = vld [vmem:[%s4027_s0 + $0x3a0] ss:$16 sps:$4 sm:$0xff]  }
 0x119   :  { %v2035_v41 = vadd.f32 %v3837_v32, %v1964_v35  ;;  %v1965_v42 = vmul.f32 %v3828_v28, %v1511_v36  ;;  %1433 = vmatmul.mubr.bf16.gmra.mrb[108].mxu1 %v3265_v31  ;;  %v1539_v59 = vpop.f32.mrb[16].mxu0 }
 0x11a   :  { %1440 = vmatprep.mubr.bf16.mxu1 %v3269_v34  ;;  %v1541_v60 = vpop.f32.mrb[17].mxu0 }
 0x11b   :  { %v2036_v46 = vadd.f32 %v3837_v32, %v1965_v42  ;;  %v2099_v48 = vmax.f32 %v2035_v41, 0.0  ;;  %v1542_v0 = vpop.f32.mrb[18].mxu0 }
 0x11c   :  { %v1226_v47 = vpop.f32.mrb[4].mxu1  ;;  %v1544_v1 = vpop.f32.mrb[19].mxu0 }
 0x11d   :  { %v2100_v49 = vmax.f32 %v2036_v46, 0.0  ;;  %v1516_v50 = vadd.f32 %v1515_v13, %v1226_v47  ;;  %v1228_v51 = vpop.f32.mrb[5].mxu1 }
 0x11e   :  { %v1229_v53 = vpop.f32.mrb[6].mxu1  ;;  %1754 = vmatmul.mubr.bf16.gmra.mrb[124].mxu0 %v3286_v61 }
 0x11f   :  { %v2817_v55 = vpack.c.bf16 %v2100_v49, %v2099_v48  ;;  %v1966_v56 = vmul.f32 %v3828_v28, %v1516_v50  ;;  %v1519_v57 = vadd.f32 %v1518_v16, %v1229_v53  ;;  %v1231_v58 = vpop.f32.mrb[7].mxu1 }
 0x121   :  { %2818 = vst [vmem:[#allocation3] sm:$0xff] %v2817_v55   ;;  %v2037_v62 = vadd.f32 %v3837_v32, %v1966_v56  ;;  %v1967_v63 = vmul.f32 %v3828_v28, %v1519_v57  ;;  %1441 = vmatmul.mubr.bf16.gmra.mrb[112].mxu1 %v3271_v52  ;;  %v1547_v15 = vpop.f32.mrb[20].mxu0 }
 0x122   :  { %1448 = vmatprep.mubr.bf16.mxu1 %v3275_v54  ;;  %v1549_v16 = vpop.f32.mrb[21].mxu0 }
 0x123   :  { %v2038_v2 = vadd.f32 %v3837_v32, %v1967_v63  ;;  %v2101_v4 = vmax.f32 %v2037_v62, 0.0  ;;  %v1550_v19 = vpop.f32.mrb[22].mxu0 }
 0x124   :  { %v1234_v3 = vpop.f32.mrb[8].mxu1  ;;  %v1552_v20 = vpop.f32.mrb[23].mxu0 }
 0x125   :  { %v2102_v5 = vmax.f32 %v2038_v2, 0.0  ;;  %v1524_v6 = vadd.f32 %v1523_v21, %v1234_v3  ;;  %v1236_v7 = vpop.f32.mrb[9].mxu1 }
 0x126   :  { %v1237_v9 = vpop.f32.mrb[10].mxu1 }
 0x127   :  { %v2822_v11 = vpack.c.bf16 %v2102_v5, %v2101_v4  ;;  %v1968_v12 = vmul.f32 %v3828_v28, %v1524_v6  ;;  %v1527_v13 = vadd.f32 %v3820_v24, %v1237_v9  ;;  %v1239_v14 = vpop.f32.mrb[11].mxu1  ;;  %v3283_v24 = vld [vmem:[%s4027_s0 + $0x3c0] ss:$16 sps:$4 sm:$0xff]  }
 0x129   :  { %2974 = vst [vmem:[#allocation3 + $0x8] sm:$0xff] %v2822_v11   ;;  %v2039_v17 = vadd.f32 %v3837_v32, %v1968_v12  ;;  %v1969_v18 = vmul.f32 %v3828_v28, %v1527_v13  ;;  %1449 = vmatmul.mubr.bf16.gmra.mrb[116].mxu1 %v3277_v8  ;;  %v1555_v36 = vpop.f32.mrb[24].mxu0 }
 0x12a   :  { %1456 = vmatprep.mubr.bf16.mxu1 %v3281_v10  ;;  %v1557_v37 = vpop.f32.mrb[25].mxu0 }
 0x12b   :  { %v2040_v21 = vadd.f32 %v3837_v32, %v1969_v18  ;;  %v2103_v23 = vmax.f32 %v2039_v17, 0.0  ;;  %v1558_v40 = vpop.f32.mrb[26].mxu0 }
 0x12c   :  { %v1242_v22 = vpop.f32.mrb[12].mxu1  ;;  %v1560_v41 = vpop.f32.mrb[27].mxu0 }
 0x12d   :  { %v2104_v25 = vmax.f32 %v2040_v21, 0.0  ;;  %v1532_v26 = vadd.f32 %v1531_v38, %v1242_v22  ;;  %v1244_v27 = vpop.f32.mrb[13].mxu1 }
 0x12e   :  { %v1245_v29 = vpop.f32.mrb[14].mxu1 }
 0x12f   :  { %v2827_v31 = vpack.c.bf16 %v2104_v25, %v2103_v23  ;;  %v1970_v33 = vmul.f32 %v3828_v28, %v1532_v26  ;;  %v1535_v34 = vadd.f32 %v3848_v43, %v1245_v29  ;;  %v1247_v35 = vpop.f32.mrb[15].mxu1  ;;  %v3289_v43 = vld [vmem:[%s4027_s0 + $0x3e0] ss:$16 sps:$4 sm:$0xff]  }
 0x131   :  { %2975 = vst [vmem:[#allocation3 + $0x10] sm:$0xff] %v2827_v31   ;;  %v2041_v38 = vadd.f32 %v3837_v32, %v1970_v33  ;;  %v1971_v39 = vmul.f32 %v3828_v28, %v1535_v34  ;;  %1457 = vmatmul.mubr.bf16.gmra.mrb[120].mxu1 %v3283_v24  ;;  %v1563_v54 = vpop.f32.mrb[28].mxu0 }
 0x132   :  { %1464 = vmatprep.mubr.bf16.mxu1 %v3287_v30  ;;  %v1565_v55 = vpop.f32.mrb[29].mxu0 }
 0x133   :  { %v2042_v42 = vadd.f32 %v3837_v32, %v1971_v39  ;;  %v2105_v45 = vmax.f32 %v2041_v38, 0.0  ;;  %v1566_v58 = vpop.f32.mrb[30].mxu0 }
 0x134   :  { %v1250_v44 = vpop.f32.mrb[16].mxu1 }
 0x135   :  { %v2106_v46 = vmax.f32 %v2042_v42, 0.0  ;;  %v1540_v47 = vadd.f32 %v1539_v59, %v1250_v44  ;;  %v1252_v48 = vpop.f32.mrb[17].mxu1  ;;  %v1568_v59 = vpop.f32.mrb[31].mxu0 }
 0x136   :  { %v1253_v49 = vpop.f32.mrb[18].mxu1 }
 0x137   :  { %v2832_v50 = vpack.c.bf16 %v2106_v46, %v2105_v45  ;;  %v1972_v51 = vmul.f32 %v3828_v28, %v1540_v47  ;;  %v1543_v52 = vadd.f32 %v1542_v0, %v1253_v49  ;;  %v1255_v53 = vpop.f32.mrb[19].mxu1 }
 0x139   :  { %2976 = vst [vmem:[#allocation3 + $0x18] sm:$0xff] %v2832_v50   ;;  %v2043_v56 = vadd.f32 %v3837_v32, %v1972_v51  ;;  %v1973_v57 = vmul.f32 %v3828_v28, %v1543_v52  ;;  %1465 = vmatmul.mubr.bf16.gmra.mrb[124].mxu1 %v3289_v43  ;;  %v1571_v7 = vpop.f32.mrb[32].mxu0 }
 0x13a   :  { %v1573_v8 = vpop.f32.mrb[33].mxu0 }
 0x13b   :  { %v2044_v60 = vadd.f32 %v3837_v32, %v1973_v57  ;;  %v2107_v62 = vmax.f32 %v2043_v56, 0.0  ;;  %v1574_v11 = vpop.f32.mrb[34].mxu0 }
 0x13c   :  { %v1258_v61 = vpop.f32.mrb[20].mxu1  ;;  %v1576_v12 = vpop.f32.mrb[35].mxu0 }
 0x13d   :  { %v2108_v63 = vmax.f32 %v2044_v60, 0.0  ;;  %v1548_v1 = vadd.f32 %v1547_v15, %v1258_v61  ;;  %v1260_v2 = vpop.f32.mrb[21].mxu1 }
 0x13e   :  { %v1261_v3 = vpop.f32.mrb[22].mxu1 }
 0x13f   :  { %v2837_v0 = vpack.c.bf16 %v2108_v63, %v2107_v62  ;;  %v1974_v4 = vmul.f32 %v3828_v28, %v1548_v1  ;;  %v1551_v5 = vadd.f32 %v1550_v19, %v1261_v3  ;;  %v1263_v6 = vpop.f32.mrb[23].mxu1 }
 0x141   :  { %2977 = vst [vmem:[#allocation3 + $0x20] sm:$0xff] %v2837_v0   ;;  %v2045_v9 = vadd.f32 %v3837_v32, %v1974_v4  ;;  %v1975_v10 = vmul.f32 %v3828_v28, %v1551_v5  ;;  %v1579_v25 = vpop.f32.mrb[36].mxu0 }
 0x142   :  { %v1581_v26 = vpop.f32.mrb[37].mxu0 }
 0x143   :  { %v2046_v13 = vadd.f32 %v3837_v32, %v1975_v10  ;;  %v2109_v15 = vmax.f32 %v2045_v9, 0.0  ;;  %v1582_v29 = vpop.f32.mrb[38].mxu0 }
 0x144   :  { %v1266_v14 = vpop.f32.mrb[24].mxu1  ;;  %v1584_v30 = vpop.f32.mrb[39].mxu0 }
 0x145   :  { %v2110_v16 = vmax.f32 %v2046_v13, 0.0  ;;  %v1556_v17 = vadd.f32 %v1555_v36, %v1266_v14  ;;  %v1268_v18 = vpop.f32.mrb[25].mxu1 }
 0x146   :  { %v1269_v20 = vpop.f32.mrb[26].mxu1 }
 0x147   :  { %v2842_v21 = vpack.c.bf16 %v2110_v16, %v2109_v15  ;;  %v1976_v19 = vmul.f32 %v3828_v28, %v1556_v17  ;;  %v1559_v22 = vadd.f32 %v1558_v40, %v1269_v20  ;;  %v1271_v23 = vpop.f32.mrb[27].mxu1 }
 0x149   :  { %2978 = vst [vmem:[#allocation3 + $0x28] sm:$0xff] %v2842_v21   ;;  %v2047_v27 = vadd.f32 %v3837_v32, %v1976_v19  ;;  %v1977_v24 = vmul.f32 %v3828_v28, %v1559_v22  ;;  %v1587_v44 = vpop.f32.mrb[40].mxu0 }
 0x14a   :  { %v1589_v45 = vpop.f32.mrb[41].mxu0 }
 0x14b   :  { %v2048_v31 = vadd.f32 %v3837_v32, %v1977_v24  ;;  %v2111_v34 = vmax.f32 %v2047_v27, 0.0  ;;  %v1590_v48 = vpop.f32.mrb[42].mxu0 }
 0x14c   :  { %v1274_v33 = vpop.f32.mrb[28].mxu1  ;;  %v1592_v43 = vpop.f32.mrb[43].mxu0 }
 0x14d   :  { %v2112_v35 = vmax.f32 %v2048_v31, 0.0  ;;  %v1564_v36 = vadd.f32 %v1563_v54, %v1274_v33  ;;  %v1276_v37 = vpop.f32.mrb[29].mxu1 }
 0x14e   :  { %v1277_v38 = vpop.f32.mrb[30].mxu1 }
 0x14f   :  { %v2847_v39 = vpack.c.bf16 %v2112_v35, %v2111_v34  ;;  %v1978_v40 = vmul.f32 %v3828_v28, %v1564_v36  ;;  %v1567_v41 = vadd.f32 %v1566_v58, %v1277_v38  ;;  %v1279_v42 = vpop.f32.mrb[31].mxu1 }
 0x151   :  { %2979 = vst [vmem:[#allocation3 + $0x30] sm:$0xff] %v2847_v39   ;;  %v2049_v46 = vadd.f32 %v3837_v32, %v1978_v40  ;;  %v1979_v47 = vmul.f32 %v3828_v28, %v1567_v41  ;;  %v1595_v60 = vpop.f32.mrb[44].mxu0 }
 0x152   :  { %v1597_v61 = vpop.f32.mrb[45].mxu0 }
 0x153   :  { %v2050_v49 = vadd.f32 %v3837_v32, %v1979_v47  ;;  %v2113_v51 = vmax.f32 %v2049_v46, 0.0  ;;  %v1598_v1 = vpop.f32.mrb[46].mxu0 }
 0x154   :  { %v1282_v50 = vpop.f32.mrb[32].mxu1  ;;  %v1600_v2 = vpop.f32.mrb[47].mxu0 }
 0x155   :  { %v2114_v52 = vmax.f32 %v2050_v49, 0.0  ;;  %v1572_v53 = vadd.f32 %v1571_v7, %v1282_v50  ;;  %v1284_v54 = vpop.f32.mrb[33].mxu1 }
 0x156   :  { %v1285_v55 = vpop.f32.mrb[34].mxu1 }
 0x157   :  { %v2852_v56 = vpack.c.bf16 %v2114_v52, %v2113_v51  ;;  %v1980_v57 = vmul.f32 %v3828_v28, %v1572_v53  ;;  %v1575_v58 = vadd.f32 %v1574_v11, %v1285_v55  ;;  %v1287_v59 = vpop.f32.mrb[35].mxu1 }
 0x159   :  { %2980 = vst [vmem:[#allocation3 + $0x38] sm:$0xff] %v2852_v56   ;;  %v2051_v62 = vadd.f32 %v3837_v32, %v1980_v57  ;;  %v1981_v63 = vmul.f32 %v3828_v28, %v1575_v58  ;;  %v1603_v13 = vpop.f32.mrb[48].mxu0 }
 0x15a   :  { %v1605_v14 = vpop.f32.mrb[49].mxu0 }
 0x15b   :  { %v2052_v3 = vadd.f32 %v3837_v32, %v1981_v63  ;;  %v2115_v4 = vmax.f32 %v2051_v62, 0.0  ;;  %v1606_v17 = vpop.f32.mrb[50].mxu0 }
 0x15c   :  { %v1290_v0 = vpop.f32.mrb[36].mxu1  ;;  %v1608_v18 = vpop.f32.mrb[51].mxu0 }
 0x15d   :  { %v2116_v5 = vmax.f32 %v2052_v3, 0.0  ;;  %v1580_v6 = vadd.f32 %v1579_v25, %v1290_v0  ;;  %v1292_v7 = vpop.f32.mrb[37].mxu1 }
 0x15e   :  { %v1293_v8 = vpop.f32.mrb[38].mxu1 }
 0x15f   :  { %v2857_v9 = vpack.c.bf16 %v2116_v5, %v2115_v4  ;;  %v1982_v10 = vmul.f32 %v3828_v28, %v1580_v6  ;;  %v1583_v11 = vadd.f32 %v1582_v29, %v1293_v8  ;;  %v1295_v12 = vpop.f32.mrb[39].mxu1 }
 0x161   :  { %2981 = vst [vmem:[#allocation3 + $0x40] sm:$0xff] %v2857_v9   ;;  %v2053_v15 = vadd.f32 %v3837_v32, %v1982_v10  ;;  %v1983_v16 = vmul.f32 %v3828_v28, %v1583_v11  ;;  %v1611_v31 = vpop.f32.mrb[52].mxu0 }
 0x162   :  { %v1613_v33 = vpop.f32.mrb[53].mxu0 }
 0x163   :  { %v2054_v20 = vadd.f32 %v3837_v32, %v1983_v16  ;;  %v2117_v19 = vmax.f32 %v2053_v15, 0.0  ;;  %v1614_v36 = vpop.f32.mrb[54].mxu0 }
 0x164   :  { %v1298_v21 = vpop.f32.mrb[40].mxu1  ;;  %v1616_v37 = vpop.f32.mrb[55].mxu0 }
 0x165   :  { %v2118_v22 = vmax.f32 %v2054_v20, 0.0  ;;  %v1588_v23 = vadd.f32 %v1587_v44, %v1298_v21  ;;  %v1300_v25 = vpop.f32.mrb[41].mxu1 }
 0x166   :  { %v1301_v26 = vpop.f32.mrb[42].mxu1 }
 0x167   :  { %v2862_v27 = vpack.c.bf16 %v2118_v22, %v2117_v19  ;;  %v1984_v24 = vmul.f32 %v3828_v28, %v1588_v23  ;;  %v1591_v29 = vadd.f32 %v1590_v48, %v1301_v26  ;;  %v1303_v30 = vpop.f32.mrb[43].mxu1 }
 0x169   :  { %2982 = vst [vmem:[#allocation3 + $0x48] sm:$0xff] %v2862_v27   ;;  %v2055_v34 = vadd.f32 %v3837_v32, %v1984_v24  ;;  %v1985_v35 = vmul.f32 %v3828_v28, %v1591_v29  ;;  %v1619_v49 = vpop.f32.mrb[56].mxu0 }
 0x16a   :  { %v1621_v50 = vpop.f32.mrb[57].mxu0 }
 0x16b   :  { %v2056_v38 = vadd.f32 %v3837_v32, %v1985_v35  ;;  %v2119_v40 = vmax.f32 %v2055_v34, 0.0  ;;  %v1622_v53 = vpop.f32.mrb[58].mxu0 }
 0x16c   :  { %v1306_v39 = vpop.f32.mrb[44].mxu1  ;;  %v1624_v54 = vpop.f32.mrb[59].mxu0 }
 0x16d   :  { %v2120_v41 = vmax.f32 %v2056_v38, 0.0  ;;  %v1596_v42 = vadd.f32 %v1595_v60, %v1306_v39  ;;  %v1308_v44 = vpop.f32.mrb[45].mxu1 }
 0x16e   :  { %v1309_v45 = vpop.f32.mrb[46].mxu1 }
 0x16f   :  { %v2867_v46 = vpack.c.bf16 %v2120_v41, %v2119_v40  ;;  %v1986_v47 = vmul.f32 %v3828_v28, %v1596_v42  ;;  %v1599_v48 = vadd.f32 %v1598_v1, %v1309_v45  ;;  %v1311_v43 = vpop.f32.mrb[47].mxu1 }
 0x171   :  { %2983 = vst [vmem:[#allocation3 + $0x50] sm:$0xff] %v2867_v46   ;;  %v2057_v51 = vadd.f32 %v3837_v32, %v1986_v47  ;;  %v1987_v52 = vmul.f32 %v3828_v28, %v1599_v48  ;;  %v1627_v3 = vpop.f32.mrb[60].mxu0 }
 0x172   :  { %v1629_v0 = vpop.f32.mrb[61].mxu0 }
 0x173   :  { %v2058_v55 = vadd.f32 %v3837_v32, %v1987_v52  ;;  %v2121_v57 = vmax.f32 %v2057_v51, 0.0  ;;  %v1630_v6 = vpop.f32.mrb[62].mxu0 }
 0x174   :  { %v1314_v56 = vpop.f32.mrb[48].mxu1  ;;  %v1632_v7 = vpop.f32.mrb[63].mxu0 }
 0x175   :  { %v2122_v58 = vmax.f32 %v2058_v55, 0.0  ;;  %v1604_v59 = vadd.f32 %v1603_v13, %v1314_v56  ;;  %v1316_v60 = vpop.f32.mrb[49].mxu1 }
 0x176   :  { %v1317_v61 = vpop.f32.mrb[50].mxu1 }
 0x177   :  { %v2872_v62 = vpack.c.bf16 %v2122_v58, %v2121_v57  ;;  %v1988_v63 = vmul.f32 %v3828_v28, %v1604_v59  ;;  %v1607_v1 = vadd.f32 %v1606_v17, %v1317_v61  ;;  %v1319_v2 = vpop.f32.mrb[51].mxu1 }
 0x179   :  { %2984 = vst [vmem:[#allocation3 + $0x58] sm:$0xff] %v2872_v62   ;;  %v2059_v4 = vadd.f32 %v3837_v32, %v1988_v63  ;;  %v1989_v5 = vmul.f32 %v3828_v28, %v1607_v1  ;;  %v1635_v20 = vpop.f32.mrb[64].mxu0 }
 0x17a   :  { %v1637_v21 = vpop.f32.mrb[65].mxu0 }
 0x17b   :  { %v2060_v8 = vadd.f32 %v3837_v32, %v1989_v5  ;;  %v2123_v10 = vmax.f32 %v2059_v4, 0.0  ;;  %v1638_v23 = vpop.f32.mrb[66].mxu0 }
 0x17c   :  { %v1322_v9 = vpop.f32.mrb[52].mxu1  ;;  %v1640_v25 = vpop.f32.mrb[67].mxu0 }
 0x17d   :  { %v2124_v11 = vmax.f32 %v2060_v8, 0.0  ;;  %v1612_v12 = vadd.f32 %v1611_v31, %v1322_v9  ;;  %v1324_v13 = vpop.f32.mrb[53].mxu1 }
 0x17e   :  { %v1325_v14 = vpop.f32.mrb[54].mxu1 }
 0x17f   :  { %v2877_v15 = vpack.c.bf16 %v2124_v11, %v2123_v10  ;;  %v1990_v16 = vmul.f32 %v3828_v28, %v1612_v12  ;;  %v1615_v17 = vadd.f32 %v1614_v36, %v1325_v14  ;;  %v1327_v18 = vpop.f32.mrb[55].mxu1 }
 0x181   :  { %2985 = vst [vmem:[#allocation3 + $0x60] sm:$0xff] %v2877_v15   ;;  %v2061_v19 = vadd.f32 %v3837_v32, %v1990_v16  ;;  %v1991_v22 = vmul.f32 %v3828_v28, %v1615_v17  ;;  %v1643_v38 = vpop.f32.mrb[68].mxu0 }
 0x182   :  { %v1645_v39 = vpop.f32.mrb[69].mxu0 }
 0x183   :  { %v2062_v26 = vadd.f32 %v3837_v32, %v1991_v22  ;;  %v2125_v24 = vmax.f32 %v2061_v19, 0.0  ;;  %v1646_v42 = vpop.f32.mrb[70].mxu0 }
 0x184   :  { %v1330_v27 = vpop.f32.mrb[56].mxu1  ;;  %v1648_v44 = vpop.f32.mrb[71].mxu0 }
 0x185   :  { %v2126_v29 = vmax.f32 %v2062_v26, 0.0  ;;  %v1620_v30 = vadd.f32 %v1619_v49, %v1330_v27  ;;  %v1332_v31 = vpop.f32.mrb[57].mxu1 }
 0x186   :  { %v1333_v33 = vpop.f32.mrb[58].mxu1 }
 0x187   :  { %v2882_v34 = vpack.c.bf16 %v2126_v29, %v2125_v24  ;;  %v1992_v35 = vmul.f32 %v3828_v28, %v1620_v30  ;;  %v1623_v36 = vadd.f32 %v1622_v53, %v1333_v33  ;;  %v1335_v37 = vpop.f32.mrb[59].mxu1 }
 0x189   :  { %2986 = vst [vmem:[#allocation3 + $0x68] sm:$0xff] %v2882_v34   ;;  %v2063_v40 = vadd.f32 %v3837_v32, %v1992_v35  ;;  %v1993_v41 = vmul.f32 %v3828_v28, %v1623_v36  ;;  %v1651_v55 = vpop.f32.mrb[72].mxu0 }
 0x18a   :  { %v1653_v56 = vpop.f32.mrb[73].mxu0 }
 0x18b   :  { %v2064_v45 = vadd.f32 %v3837_v32, %v1993_v41  ;;  %v2127_v47 = vmax.f32 %v2063_v40, 0.0  ;;  %v1654_v59 = vpop.f32.mrb[74].mxu0 }
 0x18c   :  { %v1338_v46 = vpop.f32.mrb[60].mxu1  ;;  %v1656_v60 = vpop.f32.mrb[75].mxu0 }
 0x18d   :  { %v2128_v48 = vmax.f32 %v2064_v45, 0.0  ;;  %v1628_v43 = vadd.f32 %v1627_v3, %v1338_v46  ;;  %v1340_v49 = vpop.f32.mrb[61].mxu1 }
 0x18e   :  { %v1341_v50 = vpop.f32.mrb[62].mxu1 }
 0x18f   :  { %v2887_v51 = vpack.c.bf16 %v2128_v48, %v2127_v47  ;;  %v1994_v52 = vmul.f32 %v3828_v28, %v1628_v43  ;;  %v1631_v53 = vadd.f32 %v1630_v6, %v1341_v50  ;;  %v1343_v54 = vpop.f32.mrb[63].mxu1 }
 0x191   :  { %2987 = vst [vmem:[#allocation3 + $0x70] sm:$0xff] %v2887_v51   ;;  %v2065_v57 = vadd.f32 %v3837_v32, %v1994_v52  ;;  %v1995_v58 = vmul.f32 %v3828_v28, %v1631_v53  ;;  %v1659_v8 = vpop.f32.mrb[76].mxu0 }
 0x192   :  { %v1661_v9 = vpop.f32.mrb[77].mxu0 }
 0x193   :  { %v2066_v61 = vadd.f32 %v3837_v32, %v1995_v58  ;;  %v2129_v63 = vmax.f32 %v2065_v57, 0.0  ;;  %v1662_v12 = vpop.f32.mrb[78].mxu0 }
 0x194   :  { %v1346_v62 = vpop.f32.mrb[64].mxu1  ;;  %v1664_v13 = vpop.f32.mrb[79].mxu0 }
 0x195   :  { %v2130_v1 = vmax.f32 %v2066_v61, 0.0  ;;  %v1636_v2 = vadd.f32 %v1635_v20, %v1346_v62  ;;  %v1348_v3 = vpop.f32.mrb[65].mxu1 }
 0x196   :  { %v1349_v0 = vpop.f32.mrb[66].mxu1 }
 0x197   :  { %v2892_v4 = vpack.c.bf16 %v2130_v1, %v2129_v63  ;;  %v1996_v5 = vmul.f32 %v3828_v28, %v1636_v2  ;;  %v1639_v6 = vadd.f32 %v1638_v23, %v1349_v0  ;;  %v1351_v7 = vpop.f32.mrb[67].mxu1 }
 0x199   :  { %2988 = vst [vmem:[#allocation3 + $0x78] sm:$0xff] %v2892_v4   ;;  %v2067_v10 = vadd.f32 %v3837_v32, %v1996_v5  ;;  %v1997_v11 = vmul.f32 %v3828_v28, %v1639_v6  ;;  %v1667_v26 = vpop.f32.mrb[80].mxu0 }
 0x19a   :  { %v1669_v27 = vpop.f32.mrb[81].mxu0 }
 0x19b   :  { %v2068_v14 = vadd.f32 %v3837_v32, %v1997_v11  ;;  %v2131_v16 = vmax.f32 %v2067_v10, 0.0  ;;  %v1670_v30 = vpop.f32.mrb[82].mxu0 }
 0x19c   :  { %v1354_v15 = vpop.f32.mrb[68].mxu1  ;;  %v1672_v31 = vpop.f32.mrb[83].mxu0 }
 0x19d   :  { %v2132_v17 = vmax.f32 %v2068_v14, 0.0  ;;  %v1644_v18 = vadd.f32 %v1643_v38, %v1354_v15  ;;  %v1356_v20 = vpop.f32.mrb[69].mxu1 }
 0x19e   :  { %v1357_v21 = vpop.f32.mrb[70].mxu1 }
 0x19f   :  { %v2897_v19 = vpack.c.bf16 %v2132_v17, %v2131_v16  ;;  %v1998_v22 = vmul.f32 %v3828_v28, %v1644_v18  ;;  %v1647_v23 = vadd.f32 %v1646_v42, %v1357_v21  ;;  %v1359_v25 = vpop.f32.mrb[71].mxu1 }
 0x1a1   :  { %2989 = vst [vmem:[#allocation3 + $0x80] sm:$0xff] %v2897_v19   ;;  %v2069_v24 = vadd.f32 %v3837_v32, %v1998_v22  ;;  %v1999_v29 = vmul.f32 %v3828_v28, %v1647_v23  ;;  %v1675_v45 = vpop.f32.mrb[84].mxu0 }
 0x1a2   :  { %v1677_v46 = vpop.f32.mrb[85].mxu0 }
 0x1a3   :  { %v2070_v33 = vadd.f32 %v3837_v32, %v1999_v29  ;;  %v2133_v35 = vmax.f32 %v2069_v24, 0.0  ;;  %v1678_v43 = vpop.f32.mrb[86].mxu0 }
 0x1a4   :  { %v1362_v34 = vpop.f32.mrb[72].mxu1  ;;  %v1680_v49 = vpop.f32.mrb[87].mxu0 }
 0x1a5   :  { %v2134_v36 = vmax.f32 %v2070_v33, 0.0  ;;  %v1652_v37 = vadd.f32 %v1651_v55, %v1362_v34  ;;  %v1364_v38 = vpop.f32.mrb[73].mxu1 }
 0x1a6   :  { %v1365_v39 = vpop.f32.mrb[74].mxu1 }
 0x1a7   :  { %v2902_v40 = vpack.c.bf16 %v2134_v36, %v2133_v35  ;;  %v2000_v41 = vmul.f32 %v3828_v28, %v1652_v37  ;;  %v1655_v42 = vadd.f32 %v1654_v59, %v1365_v39  ;;  %v1367_v44 = vpop.f32.mrb[75].mxu1 }
 0x1a9   :  { %2990 = vst [vmem:[#allocation3 + $0x88] sm:$0xff] %v2902_v40   ;;  %v2071_v47 = vadd.f32 %v3837_v32, %v2000_v41  ;;  %v2001_v48 = vmul.f32 %v3828_v28, %v1655_v42  ;;  %v1683_v61 = vpop.f32.mrb[88].mxu0 }
 0x1aa   :  { %v1685_v62 = vpop.f32.mrb[89].mxu0 }
 0x1ab   :  { %v2072_v50 = vadd.f32 %v3837_v32, %v2001_v48  ;;  %v2135_v52 = vmax.f32 %v2071_v47, 0.0  ;;  %v1686_v2 = vpop.f32.mrb[90].mxu0 }
 0x1ac   :  { %v1370_v51 = vpop.f32.mrb[76].mxu1  ;;  %v1688_v3 = vpop.f32.mrb[91].mxu0 }
 0x1ad   :  { %v2136_v53 = vmax.f32 %v2072_v50, 0.0  ;;  %v1660_v54 = vadd.f32 %v1659_v8, %v1370_v51  ;;  %v1372_v55 = vpop.f32.mrb[77].mxu1 }
 0x1ae   :  { %v1373_v56 = vpop.f32.mrb[78].mxu1 }
 0x1af   :  { %v2907_v57 = vpack.c.bf16 %v2136_v53, %v2135_v52  ;;  %v2002_v58 = vmul.f32 %v3828_v28, %v1660_v54  ;;  %v1663_v59 = vadd.f32 %v1662_v12, %v1373_v56  ;;  %v1375_v60 = vpop.f32.mrb[79].mxu1 }
 0x1b1   :  { %2991 = vst [vmem:[#allocation3 + $0x90] sm:$0xff] %v2907_v57   ;;  %v2073_v63 = vadd.f32 %v3837_v32, %v2002_v58  ;;  %v2003_v1 = vmul.f32 %v3828_v28, %v1663_v59  ;;  %v1691_v14 = vpop.f32.mrb[92].mxu0 }
 0x1b2   :  { %v1693_v15 = vpop.f32.mrb[93].mxu0 }
 0x1b3   :  { %v2074_v0 = vadd.f32 %v3837_v32, %v2003_v1  ;;  %v2137_v5 = vmax.f32 %v2073_v63, 0.0  ;;  %v1694_v18 = vpop.f32.mrb[94].mxu0 }
 0x1b4   :  { %v1378_v4 = vpop.f32.mrb[80].mxu1  ;;  %v1696_v20 = vpop.f32.mrb[95].mxu0 }
 0x1b5   :  { %v2138_v6 = vmax.f32 %v2074_v0, 0.0  ;;  %v1668_v7 = vadd.f32 %v1667_v26, %v1378_v4  ;;  %v1380_v8 = vpop.f32.mrb[81].mxu1 }
 0x1b6   :  { %v1381_v9 = vpop.f32.mrb[82].mxu1 }
 0x1b7   :  { %v2912_v10 = vpack.c.bf16 %v2138_v6, %v2137_v5  ;;  %v2004_v11 = vmul.f32 %v3828_v28, %v1668_v7  ;;  %v1671_v12 = vadd.f32 %v1670_v30, %v1381_v9  ;;  %v1383_v13 = vpop.f32.mrb[83].mxu1 }
 0x1b9   :  { %2992 = vst [vmem:[#allocation3 + $0x98] sm:$0xff] %v2912_v10   ;;  %v2075_v16 = vadd.f32 %v3837_v32, %v2004_v11  ;;  %v2005_v17 = vmul.f32 %v3828_v28, %v1671_v12  ;;  %v1699_v33 = vpop.f32.mrb[96].mxu0 }
 0x1ba   :  { %v1701_v34 = vpop.f32.mrb[97].mxu0 }
 0x1bb   :  { %v2076_v21 = vadd.f32 %v3837_v32, %v2005_v17  ;;  %v2139_v22 = vmax.f32 %v2075_v16, 0.0  ;;  %v1702_v37 = vpop.f32.mrb[98].mxu0 }
 0x1bc   :  { %v1386_v19 = vpop.f32.mrb[84].mxu1  ;;  %v1704_v38 = vpop.f32.mrb[99].mxu0 }
 0x1bd   :  { %v2140_v23 = vmax.f32 %v2076_v21, 0.0  ;;  %v1676_v25 = vadd.f32 %v1675_v45, %v1386_v19  ;;  %v1388_v26 = vpop.f32.mrb[85].mxu1 }
 0x1be   :  { %v1389_v27 = vpop.f32.mrb[86].mxu1 }
 0x1bf   :  { %v2917_v24 = vpack.c.bf16 %v2140_v23, %v2139_v22  ;;  %v2006_v29 = vmul.f32 %v3828_v28, %v1676_v25  ;;  %v1679_v30 = vadd.f32 %v1678_v43, %v1389_v27  ;;  %v1391_v31 = vpop.f32.mrb[87].mxu1 }
 0x1c1   :  { %2993 = vst [vmem:[#allocation3 + $0xa0] sm:$0xff] %v2917_v24   ;;  %v2077_v35 = vadd.f32 %v3837_v32, %v2006_v29  ;;  %v2007_v36 = vmul.f32 %v3828_v28, %v1679_v30  ;;  %v1707_v50 = vpop.f32.mrb[100].mxu0 }
 0x1c2   :  { %v1709_v51 = vpop.f32.mrb[101].mxu0 }
 0x1c3   :  { %v2078_v39 = vadd.f32 %v3837_v32, %v2007_v36  ;;  %v2141_v41 = vmax.f32 %v2077_v35, 0.0  ;;  %v1710_v54 = vpop.f32.mrb[102].mxu0 }
 0x1c4   :  { %v1394_v40 = vpop.f32.mrb[88].mxu1  ;;  %v1712_v55 = vpop.f32.mrb[103].mxu0 }
 0x1c5   :  { %v2142_v42 = vmax.f32 %v2078_v39, 0.0  ;;  %v1684_v44 = vadd.f32 %v1683_v61, %v1394_v40  ;;  %v1396_v45 = vpop.f32.mrb[89].mxu1 }
 0x1c6   :  { %v1397_v46 = vpop.f32.mrb[90].mxu1 }
 0x1c7   :  { %v2922_v47 = vpack.c.bf16 %v2142_v42, %v2141_v41  ;;  %v2008_v48 = vmul.f32 %v3828_v28, %v1684_v44  ;;  %v1687_v43 = vadd.f32 %v1686_v2, %v1397_v46  ;;  %v1399_v49 = vpop.f32.mrb[91].mxu1 }
 0x1c9   :  { %2994 = vst [vmem:[#allocation3 + $0xa8] sm:$0xff] %v2922_v47   ;;  %v2079_v52 = vadd.f32 %v3837_v32, %v2008_v48  ;;  %v2009_v53 = vmul.f32 %v3828_v28, %v1687_v43  ;;  %v1715_v0 = vpop.f32.mrb[104].mxu0 }
 0x1ca   :  { %v1717_v4 = vpop.f32.mrb[105].mxu0 }
 0x1cb   :  { %v2080_v56 = vadd.f32 %v3837_v32, %v2009_v53  ;;  %v2143_v58 = vmax.f32 %v2079_v52, 0.0  ;;  %v1718_v7 = vpop.f32.mrb[106].mxu0 }
 0x1cc   :  { %v1402_v57 = vpop.f32.mrb[92].mxu1  ;;  %v1720_v8 = vpop.f32.mrb[107].mxu0 }
 0x1cd   :  { %v2144_v59 = vmax.f32 %v2080_v56, 0.0  ;;  %v1692_v60 = vadd.f32 %v1691_v14, %v1402_v57  ;;  %v1404_v61 = vpop.f32.mrb[93].mxu1 }
 0x1ce   :  { %v1405_v62 = vpop.f32.mrb[94].mxu1 }
 0x1cf   :  { %v2927_v63 = vpack.c.bf16 %v2144_v59, %v2143_v58  ;;  %v2010_v1 = vmul.f32 %v3828_v28, %v1692_v60  ;;  %v1695_v2 = vadd.f32 %v1694_v18, %v1405_v62  ;;  %v1407_v3 = vpop.f32.mrb[95].mxu1 }
 0x1d1   :  { %2995 = vst [vmem:[#allocation3 + $0xb0] sm:$0xff] %v2927_v63   ;;  %v2081_v5 = vadd.f32 %v3837_v32, %v2010_v1  ;;  %v2011_v6 = vmul.f32 %v3828_v28, %v1695_v2  ;;  %v1723_v21 = vpop.f32.mrb[108].mxu0 }
 0x1d2   :  { %v1725_v19 = vpop.f32.mrb[109].mxu0 }
 0x1d3   :  { %v2082_v9 = vadd.f32 %v3837_v32, %v2011_v6  ;;  %v2145_v11 = vmax.f32 %v2081_v5, 0.0  ;;  %v1726_v25 = vpop.f32.mrb[110].mxu0  ;;  %v3988_v6 = vld [vmem:[%s4029_s2] ss:$0 sm:$0xff]  ;;  %s3317_s2 = smov [#allocation3]  }
 0x1d4   :  { %v1410_v10 = vpop.f32.mrb[96].mxu1  ;;  %v1728_v26 = vpop.f32.mrb[111].mxu0 }
 0x1d5   :  { %v2146_v12 = vmax.f32 %v2082_v9, 0.0  ;;  %v1700_v13 = vadd.f32 %v1699_v33, %v1410_v10  ;;  %v1412_v14 = vpop.f32.mrb[97].mxu1 }
 0x1d6   :  { %v1413_v15 = vpop.f32.mrb[98].mxu1 }
 0x1d7   :  { %v2932_v16 = vpack.c.bf16 %v2146_v12, %v2145_v11  ;;  %v2012_v17 = vmul.f32 %v3828_v28, %v1700_v13  ;;  %v1703_v18 = vadd.f32 %v1702_v37, %v1413_v15  ;;  %v1415_v20 = vpop.f32.mrb[99].mxu1 }
 0x1d9   :  { %2996 = vst [vmem:[#allocation3 + $0xb8] sm:$0xff] %v2932_v16   ;;  %v2083_v22 = vadd.f32 %v3837_v32, %v2012_v17  ;;  %v2013_v23 = vmul.f32 %v3828_v28, %v1703_v18  ;;  %v1731_v39 = vpop.f32.mrb[112].mxu0 }
 0x1da   :  { %v1733_v40 = vpop.f32.mrb[113].mxu0 }
 0x1db   :  { %v2084_v27 = vadd.f32 %v3837_v32, %v2013_v23  ;;  %v2147_v29 = vmax.f32 %v2083_v22, 0.0  ;;  %v1734_v44 = vpop.f32.mrb[114].mxu0 }
 0x1dc   :  { %v1418_v24 = vpop.f32.mrb[100].mxu1  ;;  %v1736_v45 = vpop.f32.mrb[115].mxu0 }
 0x1dd   :  { %v2148_v30 = vmax.f32 %v2084_v27, 0.0  ;;  %v1708_v31 = vadd.f32 %v1707_v50, %v1418_v24  ;;  %v1420_v33 = vpop.f32.mrb[101].mxu1 }
 0x1de   :  { %v1421_v34 = vpop.f32.mrb[102].mxu1 }
 0x1df   :  { %v2937_v35 = vpack.c.bf16 %v2148_v30, %v2147_v29  ;;  %v2014_v36 = vmul.f32 %v3828_v28, %v1708_v31  ;;  %v1711_v37 = vadd.f32 %v1710_v54, %v1421_v34  ;;  %v1423_v38 = vpop.f32.mrb[103].mxu1 }
 0x1e1   :  { %2997 = vst [vmem:[#allocation3 + $0xc0] sm:$0xff] %v2937_v35   ;;  %v2085_v41 = vadd.f32 %v3837_v32, %v2014_v36  ;;  %v2015_v42 = vmul.f32 %v3828_v28, %v1711_v37  ;;  %v1739_v56 = vpop.f32.mrb[116].mxu0 }
 0x1e2   :  { %v1741_v57 = vpop.f32.mrb[117].mxu0 }
 0x1e3   :  { %v2086_v46 = vadd.f32 %v3837_v32, %v2015_v42  ;;  %v2149_v48 = vmax.f32 %v2085_v41, 0.0  ;;  %v1742_v60 = vpop.f32.mrb[118].mxu0 }
 0x1e4   :  { %v1426_v47 = vpop.f32.mrb[104].mxu1  ;;  %v1744_v61 = vpop.f32.mrb[119].mxu0 }
 0x1e5   :  { %v2150_v43 = vmax.f32 %v2086_v46, 0.0  ;;  %v1716_v49 = vadd.f32 %v1715_v0, %v1426_v47  ;;  %v1428_v50 = vpop.f32.mrb[105].mxu1 }
 0x1e6   :  { %v1429_v51 = vpop.f32.mrb[106].mxu1 }
 0x1e7   :  { %v2942_v52 = vpack.c.bf16 %v2150_v43, %v2149_v48  ;;  %v2016_v53 = vmul.f32 %v3828_v28, %v1716_v49  ;;  %v1719_v54 = vadd.f32 %v1718_v7, %v1429_v51  ;;  %v1431_v55 = vpop.f32.mrb[107].mxu1 }
 0x1e9   :  { %2998 = vst [vmem:[#allocation3 + $0xc8] sm:$0xff] %v2942_v52   ;;  %v2087_v58 = vadd.f32 %v3837_v32, %v2016_v53  ;;  %v2017_v59 = vmul.f32 %v3828_v28, %v1719_v54  ;;  %v1747_v9 = vpop.f32.mrb[120].mxu0 }
 0x1ea   :  { %v1749_v10 = vpop.f32.mrb[121].mxu0 }
 0x1eb   :  { %v2088_v62 = vadd.f32 %v3837_v32, %v2017_v59  ;;  %v2151_v1 = vmax.f32 %v2087_v58, 0.0  ;;  %v3994_v32 = vld [vmem:[%s4030_s3] ss:$0 sm:$0xff]  ;;  %v1750_v13 = vpop.f32.mrb[122].mxu0  ;;  %s2488_s3 = sshll.u32 %s3317_s2, 4  ;;  %s2489_s3 = int_to_ptr.vmem [resolvable:$true] %s2488_s3 }
 0x1ec   :  { %v1434_v63 = vpop.f32.mrb[108].mxu1  ;;  %v1752_v14 = vpop.f32.mrb[123].mxu0  ;;  %s3292_s7 = scalar_lea.vmem %s2489_s3, 4096  ;;  %p3297_p1 = scmp.lt.s32.totalorder %s2489_s3, %s2489_s3 }
 0x1ed   :  { %v2152_v2 = vmax.f32 %v2088_v62, 0.0  ;;  %v1724_v3 = vadd.f32 %v1723_v21, %v1434_v63  ;;  %v1436_v0 = vpop.f32.mrb[109].mxu1  ;;  %p3293_p0 = scmp.ne.s32.totalorder %s2489_s3, %s3292_s7  ;;  %p3298_p2 = scmp.lt.s32.totalorder %s3292_s7, %s3292_s7 }
 0x1ee   :  { %v1437_v4 = vpop.f32.mrb[110].mxu1 }
 0x1ef   :  { %v2947_v5 = vpack.c.bf16 %v2152_v2, %v2151_v1  ;;  %v2018_v7 = vmul.f32 %v3988_v6, %v1724_v3  ;;  %v1727_v8 = vadd.f32 %v1726_v25, %v1437_v4  ;;  %v1439_v28 = vpop.f32.mrb[111].mxu1  ;;  %p3299_p3 = por %p3298_p2, %p3297_p1 }
 0x1f1   :  { %2999 = vst [vmem:[#allocation3 + $0xd0] sm:$0xff] %v2947_v5   ;;  %v2089_v11 = vadd.f32 %v3994_v32, %v2018_v7  ;;  %v2019_v12 = vmul.f32 %v3988_v6, %v1727_v8  ;;  %v1755_v27 = vpop.f32.mrb[124].mxu0  ;;  %p3300_p4 = pnand %p3299_p3, %p3293_p0 }
 0x1f2   :  { %v1757_v24 = vpop.f32.mrb[125].mxu0 }
 0x1f3   :  { %v2090_v15 = vadd.f32 %v3994_v32, %v2019_v12  ;;  %v2153_v17 = vmax.f32 %v2089_v11, 0.0  ;;  %v1758_v31 = vpop.f32.mrb[126].mxu0 }
 0x1f4   :  { %v1442_v16 = vpop.f32.mrb[112].mxu1  ;;  %v1760_v33 = vpop.f32.mrb[127].mxu0 }
 0x1f5   :  { %v2154_v18 = vmax.f32 %v2090_v15, 0.0  ;;  %v1732_v20 = vadd.f32 %v1731_v39, %v1442_v16  ;;  %v1444_v21 = vpop.f32.mrb[113].mxu1 }
 0x1f6   :  { %v1445_v19 = vpop.f32.mrb[114].mxu1 }
 0x1f7   :  { %v2952_v22 = vpack.c.bf16 %v2154_v18, %v2153_v17  ;;  %v2020_v23 = vmul.f32 %v3988_v6, %v1732_v20  ;;  %v1735_v25 = vadd.f32 %v1734_v44, %v1445_v19  ;;  %v1447_v26 = vpop.f32.mrb[115].mxu1 }
 0x1f9   :  { %3000 = vst [vmem:[#allocation3 + $0xd8] sm:$0xff] %v2952_v22   ;;  %v2091_v29 = vadd.f32 %v3994_v32, %v2020_v23  ;;  %v2021_v30 = vmul.f32 %v3988_v6, %v1735_v25 }
 0x1fb   :  { %v2092_v34 = vadd.f32 %v3994_v32, %v2021_v30  ;;  %v2155_v36 = vmax.f32 %v2091_v29, 0.0 }
 0x1fc   :  { %v1450_v35 = vpop.f32.mrb[116].mxu1 }
 0x1fd   :  { %v2156_v37 = vmax.f32 %v2092_v34, 0.0  ;;  %v1740_v38 = vadd.f32 %v1739_v56, %v1450_v35  ;;  %v1452_v39 = vpop.f32.mrb[117].mxu1 }
 0x1fe   :  { %v1453_v40 = vpop.f32.mrb[118].mxu1 }
 0x1ff   :  { %v2957_v41 = vpack.c.bf16 %v2156_v37, %v2155_v36  ;;  %v2022_v42 = vmul.f32 %v3988_v6, %v1740_v38  ;;  %v1743_v44 = vadd.f32 %v1742_v60, %v1453_v40  ;;  %v1455_v45 = vpop.f32.mrb[119].mxu1 }
 0x201   :  { %3001 = vst [vmem:[#allocation3 + $0xe0] sm:$0xff] %v2957_v41   ;;  %v2093_v46 = vadd.f32 %v3994_v32, %v2022_v42  ;;  %v2023_v47 = vmul.f32 %v3988_v6, %v1743_v44 }
 0x203   :  { %v2094_v48 = vadd.f32 %v3994_v32, %v2023_v47  ;;  %v2157_v49 = vmax.f32 %v2093_v46, 0.0 }
 0x204   :  { %v1458_v43 = vpop.f32.mrb[120].mxu1 }
 0x205   :  { %v2158_v50 = vmax.f32 %v2094_v48, 0.0  ;;  %v1748_v51 = vadd.f32 %v1747_v9, %v1458_v43  ;;  %v1460_v52 = vpop.f32.mrb[121].mxu1 }
 0x206   :  { %v1461_v53 = vpop.f32.mrb[122].mxu1 }
 0x207   :  { %v2962_v54 = vpack.c.bf16 %v2158_v50, %v2157_v49  ;;  %v2024_v55 = vmul.f32 %v3988_v6, %v1748_v51  ;;  %v1751_v56 = vadd.f32 %v1750_v13, %v1461_v53  ;;  %v1463_v57 = vpop.f32.mrb[123].mxu1 }
 0x209   :  { %3002 = vst [vmem:[#allocation3 + $0xe8] sm:$0xff] %v2962_v54   ;;  %v2095_v58 = vadd.f32 %v3994_v32, %v2024_v55  ;;  %v2025_v59 = vmul.f32 %v3988_v6, %v1751_v56 }
 0x20b   :  { %v2096_v60 = vadd.f32 %v3994_v32, %v2025_v59  ;;  %v2159_v62 = vmax.f32 %v2095_v58, 0.0 }
 0x20c   :  { %v1466_v61 = vpop.f32.mrb[124].mxu1 }
 0x20d   :  { %v2160_v63 = vmax.f32 %v2096_v60, 0.0  ;;  %v1756_v1 = vadd.f32 %v1755_v27, %v1466_v61  ;;  %v1468_v2 = vpop.f32.mrb[125].mxu1 }
 0x20e   :  { %v1469_v3 = vpop.f32.mrb[126].mxu1 }
 0x20f   :  { %v2967_v0 = vpack.c.bf16 %v2160_v63, %v2159_v62  ;;  %v2026_v4 = vmul.f32 %v3988_v6, %v1756_v1  ;;  %v1759_v5 = vadd.f32 %v1758_v31, %v1469_v3  ;;  %v1471_v7 = vpop.f32.mrb[127].mxu1 }
 0x211   :  { %3003 = vst [vmem:[#allocation3 + $0xf0] sm:$0xff] %v2967_v0   ;;  %v2097_v8 = vadd.f32 %v3994_v32, %v2026_v4  ;;  %v2027_v28 = vmul.f32 %v3988_v6, %v1759_v5 }
 0x213   :  { %v2098_v9 = vadd.f32 %v3994_v32, %v2027_v28  ;;  %v2161_v10 = vmax.f32 %v2097_v8, 0.0 }
 0x215   :  { %v2162_v11 = vmax.f32 %v2098_v9, 0.0 }
 0x217   :  { %v2972_v12 = vpack.c.bf16 %v2162_v11, %v2161_v10 }
 0x219   :  { %3004 = vst [vmem:[#allocation3 + $0xf8] sm:$0xff] %v2972_v12  }
 0x21a   :  { %3303 = shalt.err (!%p3300_p4)
}
 0x21b   :  { %s3304_s9 = scalar_lea.hbm %s4031_s4, 4096 }
 0x21c   :  { %p3305_p5 = scmp.ne.s32.totalorder %s4031_s4, %s3304_s9  ;;  %p3308_p6 = scmp.lt.u32.totalorder %s3304_s9, %s4031_s4 }
 0x21e   :  { %p3310_p7 = pnand %p3308_p6, %p3305_p5 }
 0x220   :  { %3313 = shalt.err (!%p3310_p7)
}
 0x221   :  { %s3318_s14 = smov 64   ;;  %s3319_s15 = smov 4  }
 0x222   :  { %2494 = dma.vmem_to_hbm [thread:$0]  %s2489_s3, 4096, %s4031_s4, [#allocation4], %s3318_s14, %s3318_s14, %s3319_s15  }
 0x223   :  { %3314 = dma.done.wait [#allocation4], 4096  }
 0x224   :  { %3315 = vsyncadd [#allocation4], 4294963200 }
 0x225   :  { %2498 = vsyncpa [#allocation4], 1 }

</bundles_post_ra>
